<compile_context>
chip_gen: v7x
topology: tpu7x:2x2x1
jax: 0.10.0
libtpu: 0.0.40
codegen_flags: <defaults>
</compile_context>

<pallas_src>
import functools

import jax
import jax.numpy as jnp
from jax.experimental import pallas as pl
from jax.experimental.pallas import tpu as pltpu

_LANE = 128


# ---------------------------------------------------------------------------
# Fused kernel: noise normalize (num_steps x inf-norm) + int cast +
# MXU one-hot gather (V-tiled, bf16 sub-chunks) + masked mean pool + linear
# head + MSE vs. state.
# ---------------------------------------------------------------------------
def _smart_loss_kernel(embed_ref, noise_ref, mask_ref, state_ref, b1_ref,
                       tw_ref, loss_ref, ids_ref, acc_ref, *,
                       num_steps, epsilon, chunk_v, c_real):
    v_idx = pl.program_id(0)
    tile_v, c_pad = tw_ref.shape
    B, S = embed_ref.shape

    @pl.when(v_idx == 0)
    def _init():
        # autograd.grad(loss, noise) is None in the reference (the .long()
        # cast detaches noise), so step == noise and each step is just an
        # inf-norm re-normalization of the noise.
        noise = noise_ref[...]                                       # (B, S) f32
        for _ in range(num_steps):                                   # static unroll
            norm = jnp.max(jnp.abs(noise), axis=-1, keepdims=True)   # (B, 1)
            noise = noise / (norm + epsilon)
        # embed_perturbed.long(): float -> int truncation toward zero.
        ids_ref[...] = (embed_ref[...] + noise).astype(jnp.int32)
        acc_ref[...] = jnp.zeros_like(acc_ref)

    # Per-token head output accumulated over vocab tiles:
    #   acc[b*S+s, :] += onehot(ids[b,s] in tile) @ tw[tile, :]
    # One-hot built per lane-sized sub-chunk (small bf16 temp), contracted on
    # the MXU with f32 accumulation.  No mask work here (applied at finalize).
    ids = ids_ref[...]                                               # (B, S) i32
    base = v_idx * tile_v
    for c in range(tile_v // chunk_v):                               # static unroll
        rel = ids - (base + c * chunk_v)                             # (B, S) i32
        iota = jax.lax.broadcasted_iota(jnp.int32, (B, S, chunk_v), 2)
        onehot = (rel[:, :, None] == iota).astype(jnp.bfloat16)      # (B,S,chunk)
        onehot2d = onehot.reshape(B * S, chunk_v)                    # leading-dim collapse
        acc_ref[...] += jnp.dot(onehot2d,
                                tw_ref[pl.ds(c * chunk_v, chunk_v), :],
                                preferred_element_type=jnp.float32)  # (B*S, C_pad)

    @pl.when(v_idx == pl.num_programs(0) - 1)
    def _finalize():
        mask = mask_ref[...]                                         # (B, S) f32
        per_tok = acc_ref[...].reshape(B, S, c_pad)                  # (B, S, C_pad)
        pooled = jnp.sum(per_tok * mask[:, :, None], axis=1)         # (B, C_pad)
        denom = jnp.maximum(jnp.sum(mask, axis=1, keepdims=True), 1.0)
        logits = pooled / denom + b1_ref[...]                        # exact divide
        diff = logits - state_ref[...]                               # pad cols == 0
        loss_ref[0, 0] = jnp.sum(diff * diff) * (1.0 / (B * c_real))  # MSE -> SMEM


# ---------------------------------------------------------------------------
# SMARTLoss.forward (sent=True)
# ---------------------------------------------------------------------------
def smart_loss_forward(embed, state, input_mask, table, w1, b1, noise_key,
                       num_steps=1, step_size=1e-3, epsilon=1e-6,
                       noise_var=1e-5, tile_v=None, chunk_v=256):
    del step_size  # gradient w.r.t. noise is structurally None in the reference
    B, S = embed.shape
    V, _ = table.shape
    C = w1.shape[1]

    # noise = torch.randn_like(embed.float()) * noise_var
    noise = jax.random.normal(noise_key, embed.shape, jnp.float32) * noise_var

    # Fold the linear head through the (linear) gather + pooling:
    #   logits = pool(onehot @ table) @ w1 + b1 = pool(onehot @ (table @ w1)) + b1
    # so only tw (V, C) enters the kernel, never the (V, H) table.
    # Product in f32; stored bf16 as the MXU rhs operand.
    tw = jnp.dot(table.astype(jnp.float32), w1.astype(jnp.float32),
                 preferred_element_type=jnp.float32).astype(jnp.bfloat16)

    # Lane-dense rhs: zero-pad the tiny head dim C up to a full 128-lane tile.
    c_pad = max(_LANE, -(-C // _LANE) * _LANE)

    assert chunk_v % _LANE == 0, "chunk_v must be a multiple of 128 lanes"
    if tile_v is None:
        v_rounded = -(-V // chunk_v) * chunk_v
        # Keep one bf16 tw tile under ~4 MiB (double-buffered => ~8 MiB; safe
        # on v7x's 64 MiB VMEM), but let small vocabularies run as a single
        # resident block so grid == (1,).
        budget_rows = (4 * 1024 * 1024) // (c_pad * 2)
        tile_v = min(v_rounded,
                     max(chunk_v, (budget_rows // chunk_v) * chunk_v),
                     8192)
    assert tile_v % chunk_v == 0, "tile_v must be a multiple of chunk_v"
    grid_v = -(-V // tile_v)
    v_pad = grid_v * tile_v

    # Zero padding: padded vocab rows / head columns contribute exactly zero
    # (ids never match padded rows; padded state/bias columns give diff == 0).
    tw_pad = jnp.zeros((v_pad, c_pad), jnp.bfloat16).at[:V, :C].set(tw)
    state_pad = jnp.zeros((B, c_pad), jnp.float32).at[:, :C].set(
        state.astype(jnp.float32))
    b1_pad = jnp.zeros((1, c_pad), jnp.float32).at[:, :C].set(
        b1.reshape(1, C).astype(jnp.float32))

    resident = lambda shape: pl.BlockSpec(shape, lambda v: (0, 0))

    kernel = functools.partial(_smart_loss_kernel, num_steps=num_steps,
                               epsilon=epsilon, chunk_v=chunk_v, c_real=C)

    # VMEM budget derived from the actual buffers (+ slack for the per-chunk
    # bf16 one-hot temporaries and pipeline bookkeeping).
    vmem_bytes = (2 * tile_v * c_pad * 2                       # double-buffered tw
                  + 2 * (3 * B * S * 4 + B * c_pad * 4 + c_pad * 4)  # residents
                  + B * S * 4 + B * S * c_pad * 4              # scratch
                  + (4 << 20))
    vmem_bytes = max(8 << 20, min(vmem_bytes, 64 << 20))

    return pl.pallas_call(
        kernel,
        out_shape=jax.ShapeDtypeStruct((1, 1), jnp.float32),
        grid_spec=pltpu.PrefetchScalarGridSpec(
            num_scalar_prefetch=0,
            grid=(grid_v,),
            in_specs=[resident((B, S)),                        # embed
                      resident((B, S)),                        # noise
                      resident((B, S)),                        # input_mask
                      resident((B, c_pad)),                    # state (padded)
                      resident((1, c_pad)),                    # b1 (padded)
                      pl.BlockSpec((tile_v, c_pad), lambda v: (v, 0))],  # tw tiles
            out_specs=pl.BlockSpec(memory_space=pltpu.MemorySpace.SMEM),
            scratch_shapes=[pltpu.VMEM((B, S), jnp.int32),         # perturbed ids
                            pltpu.VMEM((B * S, c_pad), jnp.float32)]  # per-token acc
        ),
        compiler_params=pltpu.CompilerParams(
            dimension_semantics=("arbitrary",),                # V is a reduction
            vmem_limit_bytes=vmem_bytes),
    )(embed.astype(jnp.float32), noise, input_mask.astype(jnp.float32),
      state_pad, b1_pad, tw_pad)


if __name__ == "__main__":
    B, S, V, H, C = 2, 128, 512, 32, 4

    key = jax.random.PRNGKey(0)
    k_ids, k_state, k_table, k_w1, k_noise = jax.random.split(key, 5)

    # `embed` in the module is a float tensor of token ids (it gets .long()'d).
    embed = jax.random.randint(k_ids, (B, S), 0, V).astype(jnp.float32)
    input_mask = jnp.ones((B, S), jnp.float32)
    state = jax.random.normal(k_state, (B, C), jnp.float32)

    # Deterministic synthetic parameters for eval_fn.
    table = jax.random.normal(k_table, (V, H), jnp.float32) * 0.02
    w1 = jax.random.normal(k_w1, (H, C), jnp.float32) * 0.02
    b1 = jnp.zeros((1, C), jnp.float32)

    loss = smart_loss_forward(embed, state, input_mask, table, w1, b1, k_noise,
                              num_steps=1, step_size=1e-3, epsilon=1e-6,
                              noise_var=1e-5)
    loss = jax.block_until_ready(loss)
    assert loss.shape == (1, 1) and bool(jnp.isfinite(loss).all())
    print("KERNEL_OK")
</pallas_src>

<mosaic_0001>
module attributes {stable_mosaic.version = 11 : i64} {
  func.func @_smart_loss_kernel(%arg0: i32, %arg1: memref<2x128xf32, #tpu.memory_space<vmem>>, %arg2: memref<2x128xf32, #tpu.memory_space<vmem>>, %arg3: memref<2x128xf32, #tpu.memory_space<vmem>>, %arg4: memref<2x128xf32, #tpu.memory_space<vmem>>, %arg5: memref<1x128xf32, #tpu.memory_space<vmem>>, %arg6: memref<512x128xbf16, #tpu.memory_space<vmem>>, %arg7: memref<1x1xf32, #tpu.memory_space<smem>>, %arg8: memref<2x128xi32, #tpu.memory_space<vmem>>, %arg9: memref<256x128xf32, #tpu.memory_space<vmem>>) attributes {dimension_semantics = [#tpu.dimension_semantics<arbitrary>], iteration_bounds = array<i64: 1>, scalar_prefetch = 0 : i64, scratch_operands = 2 : i64, tpu.core_type = #tpu.core_type<tc>, window_params = [{pipeline_mode = #tpu.pipeline_mode<synchronous>, transform_indices = @transform_0, window_bounds = array<i64: 2, 128>}, {pipeline_mode = #tpu.pipeline_mode<synchronous>, transform_indices = @transform_1, window_bounds = array<i64: 2, 128>}, {pipeline_mode = #tpu.pipeline_mode<synchronous>, transform_indices = @transform_2, window_bounds = array<i64: 2, 128>}, {pipeline_mode = #tpu.pipeline_mode<synchronous>, transform_indices = @transform_3, window_bounds = array<i64: 2, 128>}, {pipeline_mode = #tpu.pipeline_mode<synchronous>, transform_indices = @transform_4, window_bounds = array<i64: 1, 128>}, {transform_indices = @transform_5, window_bounds = array<i64: 512, 128>}, {transform_indices = @transform_6, window_bounds = array<i64: 1, 1>}]} {
    %c0_i32 = arith.constant 0 : i32
    %0 = arith.cmpi eq, %arg0, %c0_i32 : i32
    %1 = arith.extui %0 : i1 to i32
    %c0_i32_0 = arith.constant 0 : i32
    %2 = arith.cmpi ne, %1, %c0_i32_0 : i32
    scf.if %2 {
      %c0_17 = arith.constant 0 : index
      %c0_18 = arith.constant 0 : index
      %40 = vector.load %arg2[%c0_17, %c0_18] : memref<2x128xf32, #tpu.memory_space<vmem>>, vector<2x128xf32>
      %41 = math.absf %40 : vector<2x128xf32>
      %cst_19 = arith.constant dense<0xFF800000> : vector<2xf32>
      %42 = vector.multi_reduction <maximumf>, %41, %cst_19 [1] : vector<2x128xf32> to vector<2xf32>
      %43 = vector.shape_cast %42 : vector<2xf32> to vector<2x1xf32>
      %cst_20 = arith.constant 9.99999997E-7 : f32
      %44 = vector.broadcast %cst_20 : f32 to vector<2x1xf32>
      %45 = arith.addf %43, %44 : vector<2x1xf32>
      %46 = vector.broadcast %45 : vector<2x1xf32> to vector<2x128xf32>
      %47 = arith.divf %40, %46 : vector<2x128xf32>
      %c0_21 = arith.constant 0 : index
      %c0_22 = arith.constant 0 : index
      %48 = vector.load %arg1[%c0_21, %c0_22] : memref<2x128xf32, #tpu.memory_space<vmem>>, vector<2x128xf32>
      %49 = arith.addf %48, %47 : vector<2x128xf32>
      %50 = arith.fptosi %49 : vector<2x128xf32> to vector<2x128xi32>
      %c0_23 = arith.constant 0 : index
      %c0_24 = arith.constant 0 : index
      %51 = vector.load %arg8[%c0_23, %c0_24] : memref<2x128xi32, #tpu.memory_space<vmem>>, vector<2x128xi32>
      tpu.vector_store %arg8[%c0_23, %c0_24], %50 {strides = array<i32>} : memref<2x128xi32, #tpu.memory_space<vmem>>, vector<2x128xi32>,
      %cst_25 = arith.constant 0.000000e+00 : f32
      %52 = vector.broadcast %cst_25 : f32 to vector<256x128xf32>
      %c0_26 = arith.constant 0 : index
      %c0_27 = arith.constant 0 : index
      %53 = vector.load %arg9[%c0_26, %c0_27] : memref<256x128xf32, #tpu.memory_space<vmem>>, vector<256x128xf32>
      tpu.vector_store %arg9[%c0_26, %c0_27], %52 {strides = array<i32>} : memref<256x128xf32, #tpu.memory_space<vmem>>, vector<256x128xf32>,
    } else {
    }
    %c0 = arith.constant 0 : index
    %c0_1 = arith.constant 0 : index
    %3 = vector.load %arg8[%c0, %c0_1] : memref<2x128xi32, #tpu.memory_space<vmem>>, vector<2x128xi32>
    %c512_i32 = arith.constant 512 : i32
    %4 = arith.muli %arg0, %c512_i32 : i32
    %c0_i32_2 = arith.constant 0 : i32
    %5 = arith.addi %4, %c0_i32_2 : i32
    %6 = vector.broadcast %5 : i32 to vector<2x128xi32>
    %7 = arith.subi %3, %6 : vector<2x128xi32>
    %8 = tpu.iota {dimensions = array<i32: 2>} : vector<2x128x256xi32>
    %9 = vector.shape_cast %7 : vector<2x128xi32> to vector<2x128x1xi32>
    %10 = vector.broadcast %9 : vector<2x128x1xi32> to vector<2x128x256xi32>
    %11 = arith.cmpi eq, %10, %8 : vector<2x128x256xi32>
    %12 = arith.extui %11 : vector<2x128x256xi1> to vector<2x128x256xi32>
    %13 = arith.sitofp %12 : vector<2x128x256xi32> to vector<2x128x256xf32>
    %14 = arith.truncf %13 : vector<2x128x256xf32> to vector<2x128x256xbf16>
    %15 = vector.shape_cast %14 : vector<2x128x256xbf16> to vector<256x256xbf16>
    %c0_3 = arith.constant 0 : index
    %c0_4 = arith.constant 0 : index
    %16 = vector.load %arg9[%c0_3, %c0_4] : memref<256x128xf32, #tpu.memory_space<vmem>>, vector<256x128xf32>
    %c0_5 = arith.constant 0 : index
    %c0_6 = arith.constant 0 : index
    %17 = vector.load %arg6[%c0_5, %c0_6] : memref<512x128xbf16, #tpu.memory_space<vmem>>, vector<256x128xbf16>
    %cst = arith.constant dense<0.000000e+00> : vector<256x128xf32>
    %18 = tpu.matmul %15, %17, %cst {dimension_numbers = #tpu.dot_dimension_numbers<[1], [0], [0], [1], [0, 0, 1, 1], [], []>} : vector<256x256xbf16>, vector<256x128xbf16>, vector<256x128xf32> -> vector<256x128xf32>
    %19 = arith.addf %16, %18 : vector<256x128xf32>
    %c0_7 = arith.constant 0 : index
    %c0_8 = arith.constant 0 : index
    %20 = vector.load %arg9[%c0_7, %c0_8] : memref<256x128xf32, #tpu.memory_space<vmem>>, vector<256x128xf32>
    tpu.vector_store %arg9[%c0_7, %c0_8], %19 {strides = array<i32>} : memref<256x128xf32, #tpu.memory_space<vmem>>, vector<256x128xf32>,
    %c256_i32 = arith.constant 256 : i32
    %21 = arith.addi %4, %c256_i32 : i32
    %22 = vector.broadcast %21 : i32 to vector<2x128xi32>
    %23 = arith.subi %3, %22 : vector<2x128xi32>
    %24 = tpu.iota {dimensions = array<i32: 2>} : vector<2x128x256xi32>
    %25 = vector.shape_cast %23 : vector<2x128xi32> to vector<2x128x1xi32>
    %26 = vector.broadcast %25 : vector<2x128x1xi32> to vector<2x128x256xi32>
    %27 = arith.cmpi eq, %26, %24 : vector<2x128x256xi32>
    %28 = arith.extui %27 : vector<2x128x256xi1> to vector<2x128x256xi32>
    %29 = arith.sitofp %28 : vector<2x128x256xi32> to vector<2x128x256xf32>
    %30 = arith.truncf %29 : vector<2x128x256xf32> to vector<2x128x256xbf16>
    %31 = vector.shape_cast %30 : vector<2x128x256xbf16> to vector<256x256xbf16>
    %c0_9 = arith.constant 0 : index
    %c0_10 = arith.constant 0 : index
    %32 = vector.load %arg9[%c0_9, %c0_10] : memref<256x128xf32, #tpu.memory_space<vmem>>, vector<256x128xf32>
    %c256 = arith.constant 256 : index
    %c0_11 = arith.constant 0 : index
    %33 = vector.load %arg6[%c256, %c0_11] : memref<512x128xbf16, #tpu.memory_space<vmem>>, vector<256x128xbf16>
    %cst_12 = arith.constant dense<0.000000e+00> : vector<256x128xf32>
    %34 = tpu.matmul %31, %33, %cst_12 {dimension_numbers = #tpu.dot_dimension_numbers<[1], [0], [0], [1], [0, 0, 1, 1], [], []>} : vector<256x256xbf16>, vector<256x128xbf16>, vector<256x128xf32> -> vector<256x128xf32>
    %35 = arith.addf %32, %34 : vector<256x128xf32>
    %c0_13 = arith.constant 0 : index
    %c0_14 = arith.constant 0 : index
    %36 = vector.load %arg9[%c0_13, %c0_14] : memref<256x128xf32, #tpu.memory_space<vmem>>, vector<256x128xf32>
    tpu.vector_store %arg9[%c0_13, %c0_14], %35 {strides = array<i32>} : memref<256x128xf32, #tpu.memory_space<vmem>>, vector<256x128xf32>,
    %c0_i32_15 = arith.constant 0 : i32
    %37 = arith.cmpi eq, %arg0, %c0_i32_15 : i32
    %38 = arith.extui %37 : i1 to i32
    %c0_i32_16 = arith.constant 0 : i32
    %39 = arith.cmpi ne, %38, %c0_i32_16 : i32
    scf.if %39 {
      %c0_17 = arith.constant 0 : index
      %c0_18 = arith.constant 0 : index
      %40 = vector.load %arg3[%c0_17, %c0_18] : memref<2x128xf32, #tpu.memory_space<vmem>>, vector<2x128xf32>
      %c0_19 = arith.constant 0 : index
      %c0_20 = arith.constant 0 : index
      %41 = vector.load %arg9[%c0_19, %c0_20] : memref<256x128xf32, #tpu.memory_space<vmem>>, vector<256x128xf32>
      %42 = vector.shape_cast %41 : vector<256x128xf32> to vector<2x128x128xf32>
      %43 = vector.shape_cast %40 : vector<2x128xf32> to vector<2x128x1xf32>
      %44 = vector.broadcast %43 : vector<2x128x1xf32> to vector<2x128x128xf32>
      %45 = arith.mulf %42, %44 : vector<2x128x128xf32>
      %cst_21 = arith.constant dense<0.000000e+00> : vector<2x128xf32>
      %46 = vector.multi_reduction <add>, %45, %cst_21 [1] : vector<2x128x128xf32> to vector<2x128xf32>
      %cst_22 = arith.constant dense<0.000000e+00> : vector<2xf32>
      %47 = vector.multi_reduction <add>, %40, %cst_22 [1] : vector<2x128xf32> to vector<2xf32>
      %48 = vector.shape_cast %47 : vector<2xf32> to vector<2x1xf32>
      %cst_23 = arith.constant 1.000000e+00 : f32
      %49 = vector.broadcast %cst_23 : f32 to vector<2x1xf32>
      %50 = arith.maximumf %48, %49 : vector<2x1xf32>
      %51 = vector.broadcast %50 : vector<2x1xf32> to vector<2x128xf32>
      %52 = arith.divf %46, %51 : vector<2x128xf32>
      %c0_24 = arith.constant 0 : index
      %c0_25 = arith.constant 0 : index
      %53 = vector.load %arg5[%c0_24, %c0_25] : memref<1x128xf32, #tpu.memory_space<vmem>>, vector<1x128xf32>
      %54 = vector.broadcast %53 : vector<1x128xf32> to vector<2x128xf32>
      %55 = arith.addf %52, %54 : vector<2x128xf32>
      %c0_26 = arith.constant 0 : index
      %c0_27 = arith.constant 0 : index
      %56 = vector.load %arg4[%c0_26, %c0_27] : memref<2x128xf32, #tpu.memory_space<vmem>>, vector<2x128xf32>
      %57 = arith.subf %55, %56 : vector<2x128xf32>
      %58 = arith.mulf %57, %57 : vector<2x128xf32>
      %59 = vector.shape_cast %58 : vector<2x128xf32> to vector<1x2x128xf32>
      %cst_28 = arith.constant dense<0.000000e+00> : vector<1xf32>
      %60 = vector.multi_reduction <add>, %59, %cst_28 [1, 2] : vector<1x2x128xf32> to vector<1xf32>
      %61 = vector.shape_cast %60 : vector<1xf32> to vector<1x1x1xf32>
      %62 = vector.extract %61[0, 0, 0] : f32 from vector<1x1x1xf32>
      %cst_29 = arith.constant 1.250000e-01 : f32
      %63 = arith.mulf %62, %cst_29 : f32
      %c0_30 = arith.constant 0 : index
      %c0_31 = arith.constant 0 : index
      %64 = memref.load %arg7[%c0_30, %c0_31] : memref<1x1xf32, #tpu.memory_space<smem>>
      memref.store %63, %arg7[%c0_30, %c0_31] : memref<1x1xf32, #tpu.memory_space<smem>>
    } else {
    }
    return
  }
  func.func @transform_0(%arg0: i32) -> (i32, i32) {
    %c0_i32 = arith.constant 0 : i32
    %c0_i32_0 = arith.constant 0 : i32
    %c0_i32_1 = arith.constant 0 : i32
    return %c0_i32, %c0_i32_0 : i32, i32
  }
  func.func @transform_1(%arg0: i32) -> (i32, i32) {
    %c0_i32 = arith.constant 0 : i32
    %c0_i32_0 = arith.constant 0 : i32
    %c0_i32_1 = arith.constant 0 : i32
    return %c0_i32, %c0_i32_0 : i32, i32
  }
  func.func @transform_2(%arg0: i32) -> (i32, i32) {
    %c0_i32 = arith.constant 0 : i32
    %c0_i32_0 = arith.constant 0 : i32
    %c0_i32_1 = arith.constant 0 : i32
    return %c0_i32, %c0_i32_0 : i32, i32
  }
  func.func @transform_3(%arg0: i32) -> (i32, i32) {
    %c0_i32 = arith.constant 0 : i32
    %c0_i32_0 = arith.constant 0 : i32
    %c0_i32_1 = arith.constant 0 : i32
    return %c0_i32, %c0_i32_0 : i32, i32
  }
  func.func @transform_4(%arg0: i32) -> (i32, i32) {
    %c0_i32 = arith.constant 0 : i32
    %c0_i32_0 = arith.constant 0 : i32
    %c0_i32_1 = arith.constant 0 : i32
    return %c0_i32, %c0_i32_0 : i32, i32
  }
  func.func @transform_5(%arg0: i32) -> (i32, i32) {
    %c0_i32 = arith.constant 0 : i32
    %c0_i32_0 = arith.constant 0 : i32
    return %arg0, %c0_i32 : i32, i32
  }
  func.func @transform_6(%arg0: i32) -> (i32, i32) {
    %c0_i32 = arith.constant 0 : i32
    %c0_i32_0 = arith.constant 0 : i32
    %c0_i32_1 = arith.constant 0 : i32
    return %c0_i32, %c0_i32_0 : i32, i32
  }
}

</mosaic_0001>

<bundles_post_ra>
// kernel: tpu_custom_call.1
= control target key start
LH: loop header
LB: loop body
LE: loop exit
PB: predicated region body
PF: predicated region fallthrough
CT: control target
= control target key end

     0   :  { %11 = vsyncpa [#allocation5], 0  ;;  %s3036_s0 = inlined_call_operand.hbm [shape: f32[2,128], index: 0, kind: input, shape index: {}]   ;;  %s3037_s1 = inlined_call_operand.vmem [shape: f32[2,128], index: 1, kind: input, shape index: {}]   ;;  %s3038_s2 = inlined_call_operand.vmem [shape: f32[2,128], index: 2, kind: input, shape index: {}]   ;;  %s3039_s3 = inlined_call_operand.vmem [shape: f32[2,128], index: 3, kind: input, shape index: {}]   ;;  %s3040_s4 = inlined_call_operand.vmem [shape: f32[1,128], index: 4, kind: input, shape index: {}]   ;;  %s3041_s5 = inlined_call_operand.hbm [shape: bf16[512,128], index: 5, kind: input, shape index: {}]   ;;  %s3042_s6 = inlined_call_operand.hbm [shape: f32[1,1], index: 6, kind: output, shape index: {}]  }
   0x1   :  { %12 = vsyncpa [#allocation8], 0 }
   0x2   :  { %13 = vsyncpa [#allocation6], 0  ;;  %s2527_s21 = smov [#allocation4]   ;;  %s2528_s23 = smov [#allocation7]  }
   0x3   :  { %s20_s22 = sshll.u32 %s2527_s21, 4  ;;  %s37_s24 = sshll.u32 %s2528_s23, 4  ;;  %s21_s22 = int_to_ptr.vmem [resolvable:$true] %s20_s22  ;;  %s2568_s24 = int_to_ptr.vmem [resolvable:$true] %s37_s24 }
   0x4   :  { %s2467_s27 = scalar_lea.hbm %s3036_s0, 32 }
   0x5   :  { %p2468_p0 = scmp.ne.s32.totalorder %s3036_s0, %s2467_s27  ;;  %p2471_p1 = scmp.lt.u32.totalorder %s2467_s27, %s3036_s0 }
   0x7   :  { %p2473_p2 = pnand %p2471_p1, %p2468_p0 }
   0x9   :  { %2476 = shalt.err (!%p2473_p2)
}
   0xa   :  { %s2477_s8 = scalar_lea.vmem %s21_s22, 32  ;;  %p2482_p4 = scmp.lt.s32.totalorder %s21_s22, %s21_s22 }
   0xb   :  { %p2478_p3 = scmp.ne.s32.totalorder %s21_s22, %s2477_s8  ;;  %p2483_p5 = scmp.lt.s32.totalorder %s2477_s8, %s2477_s8 }
   0xd   :  { %p2484_p6 = por %p2483_p5, %p2482_p4 }
   0xf   :  { %p2485_p7 = pnand %p2484_p6, %p2478_p3 }
  0x11   :  { %2488 = shalt.err (!%p2485_p7)
}
  0x12   :  { %23 = dma.hbm_to_vmem [thread:$0]  %s3036_s0, 32, %s21_s22, [#allocation5]  }
  0x13   :  { %s2489_s13 = scalar_lea.hbm %s3041_s5, 4096 }
  0x14   :  { %p2490_p8 = scmp.ne.s32.totalorder %s3041_s5, %s2489_s13  ;;  %p2493_p9 = scmp.lt.u32.totalorder %s2489_s13, %s3041_s5 }
  0x16   :  { %p2495_p10 = pnand %p2493_p9, %p2490_p8 }
  0x18   :  { %2498 = shalt.err (!%p2495_p10)
}
  0x19   :  { %s2499_s18 = scalar_lea.vmem %s2568_s24, 4096  ;;  %p2504_p12 = scmp.lt.s32.totalorder %s2568_s24, %s2568_s24 }
  0x1a   :  { %p2500_p11 = scmp.ne.s32.totalorder %s2568_s24, %s2499_s18  ;;  %p2505_p13 = scmp.lt.s32.totalorder %s2499_s18, %s2499_s18 }
  0x1c   :  { %p2506_p0 = por %p2505_p13, %p2504_p12 }
  0x1e   :  { %p2507_p1 = pnand %p2506_p0, %p2500_p11 }
  0x20   :  { %2510 = shalt.err (!%p2507_p1)
}
  0x21   :  { %s2529_s0 = smov 64   ;;  %s2530_s19 = smov 4  }
  0x22   :  { %43 = dma.hbm_to_vmem [thread:$0]  %s3041_s5, 4096, %s2568_s24, [#allocation8], %s2529_s0, %s2529_s0, %s2530_s19  }
  0x23   :  { %2521 = dma.done.wait [#allocation5], 32  }
  0x24   :  { %2522 = vsyncadd [#allocation5], 4294967264 }
  0x25   :  { %2523 = dma.done.wait [#allocation8], 4096  }
  0x26   :  { %2524 = vsyncadd [#allocation8], 4294963200  ;;  %v55_v0 = vld [vmem:[%s3037_s1] sm:$0x3]  ;;  %vm57_vm0 = vcmask 1041408   ;;  %v2429_v3 = vld [vmem:[#allocation7 + $0x40] sm:$0xff]   ;;  %v104_v33 = vlaneseq }
  0x27   :  { %v56_v1 = vand.u32 2147483647, %v55_v0  ;;  %v2430_v4 = vld [vmem:[#allocation7] sm:$0xff]   ;;  %2195 = vmatprep.subr.bf16.mxu0 %v2429_v3  ;;  %v2431_v5 = vld [vmem:[#allocation7 + $0x48] sm:$0xff]   ;;  %v2433_v7 = vld [vmem:[#allocation7 + $0x50] sm:$0xff]   ;;  %s2511_s29 = scalar_lea.hbm %s3042_s6, 16 }
  0x28   :  { %2196 = vmatpush3.bf16.msra.mxu0 %v2430_v4  ;;  %v2432_v6 = vld [vmem:[#allocation7 + $0x8] sm:$0xff]   ;;  %v2434_v8 = vld [vmem:[#allocation7 + $0x10] sm:$0xff]   ;;  %v2435_v10 = vld [vmem:[#allocation7 + $0x58] sm:$0xff]   ;;  %v108_v37 = vshrl.u32 %v104_v33, 7  ;;  %v2635_v53 = vand.u32 127, %v104_v33  ;;  %p2512_p2 = scmp.ne.s32.totalorder %s3042_s6, %s2511_s29  ;;  %p2515_p3 = scmp.lt.u32.totalorder %s2511_s29, %s3042_s6 }
  0x29   :  { %v58_v2 = vsel %vm57_vm0, %v56_v1, -inf  ;;  %2197 = vmatprep.subr.bf16.mxu0 %v2431_v5  ;;  %v2436_v11 = vld [vmem:[#allocation7 + $0x18] sm:$0xff]   ;;  %v2437_v13 = vld [vmem:[#allocation7 + $0x60] sm:$0xff]   ;;  %v2441_v17 = vld [vmem:[#allocation7 + $0x68] sm:$0xff]   ;;  %v2531_v59 = vmov 1.0|1.0  }
  0x2a   :  { %59 = vmax.xlane.f32.xlu0 %v58_v2  ;;  %v2438_v14 = vld [vmem:[#allocation7 + $0xc0] sm:$0xff]   ;;  %v2442_v18 = vld [vmem:[#allocation7 + $0xc8] sm:$0xff]   ;;  %v2445_v21 = vld [vmem:[#allocation7 + $0x70] sm:$0xff]   ;;  %v2604_v40 = vsub.s32 0, %v108_v37  ;;  %v176_v50 = vsub.s32 1, %v108_v37  ;;  %v2645_v55 = vadd.s32 128, %v2635_v53  ;;  %p2517_p4 = pnand %p2515_p3, %p2512_p2 }
  0x2b   :  { %v2439_v15 = vld [vmem:[#allocation7 + $0x20] sm:$0xff]   ;;  %2307 = vmatprep.subr.bf16.mxu1 %v2438_v14  ;;  %v2443_v19 = vld [vmem:[#allocation7 + $0x28] sm:$0xff]   ;;  %v2446_v22 = vld [vmem:[#allocation7 + $0xd0] sm:$0xff]  }
  0x2c   :  { %2198 = vmatpush3.bf16.msra.mxu0 %v2432_v6  ;;  %v2440_v16 = vld [vmem:[#allocation7 + $0x80] sm:$0xff]   ;;  %v2444_v20 = vld [vmem:[#allocation7 + $0x88] sm:$0xff]   ;;  %v2447_v23 = vld [vmem:[#allocation7 + $0x30] sm:$0xff]  }
  0x2d   :  { %2199 = vmatprep.subr.bf16.mxu0 %v2433_v7  ;;  %2308 = vmatpush3.bf16.msra.mxu1 %v2440_v16  ;;  %v64_v25 = vld [vmem:[#allocation4] sm:$0x3]  ;;  %v2448_v26 = vld [vmem:[#allocation7 + $0x90] sm:$0xff]   ;;  %v2453_v36 = vld [vmem:[#allocation7 + $0xe0] sm:$0xff]  }
  0x2e   :  { %2309 = vmatprep.subr.bf16.mxu1 %v2442_v18  ;;  %v2449_v29 = vld [vmem:[#allocation7 + $0x78] sm:$0xff]   ;;  %v2454_v38 = vld [vmem:[#allocation7 + $0xa0] sm:$0xff]   ;;  %v2455_v39 = vld [vmem:[#allocation7 + $0xe8] sm:$0xff]  }
  0x2f   :  { %v2450_v30 = vld [vmem:[#allocation7 + $0xd8] sm:$0xff]   ;;  %v2456_v41 = vld [vmem:[#allocation7 + $0xa8] sm:$0xff]   ;;  %v2457_v43 = vld [vmem:[#allocation7 + $0xf0] sm:$0xff]  }
  0x30   :  { %2200 = vmatpush3.bf16.msra.mxu0 %v2434_v8  ;;  %v2451_v31 = vld [vmem:[#allocation7 + $0x38] sm:$0xff]   ;;  %v2458_v45 = vld [vmem:[#allocation7 + $0xb0] sm:$0xff]  }
  0x31   :  { %2201 = vmatprep.subr.bf16.mxu0 %v2435_v10  ;;  %2310 = vmatpush3.bf16.msra.mxu1 %v2444_v20  ;;  %v2452_v32 = vld [vmem:[#allocation7 + $0x98] sm:$0xff]  }
  0x32   :  { %2311 = vmatprep.subr.bf16.mxu1 %v2446_v22  ;;  %v2459_v46 = vld [vmem:[#allocation7 + $0xf8] sm:$0xff]  }
  0x33   :  { %v2460_v48 = vld [vmem:[#allocation7 + $0xb8] sm:$0xff]  }
  0x34   :  { %2202 = vmatpush3.bf16.msra.mxu0 %v2436_v11  ;;  %v2642_v54 = vld [vmem:[%s3038_s2] sm:$0x3] }
  0x35   :  { %2203 = vmatprep.subr.bf16.mxu0 %v2437_v13  ;;  %2312 = vmatpush3.bf16.msra.mxu1 %v2448_v26  ;;  %v2650_v56 = vrot.slane %v2642_v54, %v176_v50  ;;  %v2661_v60 = vrot.slane %v2642_v54, %v2604_v40 }
  0x36   :  { %2313 = vmatprep.subr.bf16.mxu1 %v2450_v30 }
  0x38   :  { %2204 = vmatpush3.bf16.msra.mxu0 %v2439_v15 }
  0x39   :  { %2205 = vmatprep.subr.bf16.mxu0 %v2441_v17  ;;  %2314 = vmatpush3.bf16.msra.mxu1 %v2452_v32 }
  0x3a   :  { %2315 = vmatprep.subr.bf16.mxu1 %v2453_v36 }
  0x3c   :  { %2206 = vmatpush3.bf16.msra.mxu0 %v2443_v19 }
  0x3d   :  { %2207 = vmatprep.subr.bf16.mxu0 %v2445_v21  ;;  %2316 = vmatpush3.bf16.msra.mxu1 %v2454_v38  ;;  %v1841_v38 = vsel %vm57_vm0, %v2642_v54, 0.0 }
  0x3e   :  { %2317 = vmatprep.subr.bf16.mxu1 %v2455_v39 }
  0x40   :  { %2208 = vmatpush3.bf16.msra.mxu0 %v2447_v23 }
  0x41   :  { %2209 = vmatprep.subr.bf16.mxu0 %v2449_v29  ;;  %2318 = vmatpush3.bf16.msra.mxu1 %v2456_v41 }
  0x42   :  { %2319 = vmatprep.subr.bf16.mxu1 %v2457_v43 }
  0x44   :  { %2210 = vmatpush3.bf16.msra.mxu0 %v2451_v31 }
  0x45   :  { %2320 = vmatpush3.bf16.msra.mxu1 %v2458_v45 }
  0x46   :  { %2321 = vmatprep.subr.bf16.mxu1 %v2459_v46 }
  0x49   :  { %2322 = vmatpush3.bf16.msra.mxu1 %v2460_v48 }
  0xb7   :  { %v60_v9 = vpop.xlane.xlu0 %59 }
  0xb8   :  { %v61_v12 = vadd.f32 1e-06, %v60_v9 }
  0xba   :  { %2461 = vrcp.f32 %v61_v12 }
  0xc4   :  { %v2462_v24 = vpop.eup %2461 }
  0xc5   :  { %v63_v27 = vmul.f32 %v2462_v24, %v55_v0 }
  0xc7   :  { %v65_v28 = vadd.f32 %v64_v25, %v63_v27 }
  0xc9   :  { %v2419_v34 = vtrunc.f32 %v65_v28 }
  0xcb   :  { %v2420_v35 = vcvt.f32.s32 %v2419_v34 }
  0xcd   :  { %67 = vst [vmem:[#allocation2] sm:$0x3] %v2420_v35 }
  0xd4   :  { %v100_v42 = vld [vmem:[#allocation2] sm:$0x3] }
  0xd5   :  { %v110_v44 = vrot.slane %v100_v42, %v2604_v40  ;;  %v2049_v47 = vadd.s32 4294967040, %v100_v42  ;;  %v2608_v51 = vrot.slane %v100_v42, %v176_v50 }
  0xd7   :  { %116 = vbcast.lane.b32.xlu1 %v110_v44, 264  ;;  %112 = vbcast.lane.b32.xlu0 %v110_v44, 256  ;;  %v856_v49 = vrot.slane %v2049_v47, %v2604_v40  ;;  %v2611_v52 = vrot.slane %v2049_v47, %v176_v50 }
  0xdb   :  { %120 = vbcast.lane.b32.xlu1 %v110_v44, 272  ;;  %128 = vbcast.lane.b32.xlu0 %v110_v44, 288 }
  0xdf   :  { %124 = vbcast.lane.b32.xlu1 %v110_v44, 280  ;;  %874 = vbcast.lane.b32.xlu0 %v856_v49, 288 }
  0xe3   :  { %858 = vbcast.lane.b32.xlu1 %v856_v49, 256  ;;  %136 = vbcast.lane.b32.xlu0 %v110_v44, 304 }
  0xe7   :  { %862 = vbcast.lane.b32.xlu1 %v856_v49, 264  ;;  %882 = vbcast.lane.b32.xlu0 %v856_v49, 304 }
  0xeb   :  { %866 = vbcast.lane.b32.xlu1 %v856_v49, 272  ;;  %144 = vbcast.lane.b32.xlu0 %v110_v44, 320 }
  0xef   :  { %870 = vbcast.lane.b32.xlu1 %v856_v49, 280  ;;  %890 = vbcast.lane.b32.xlu0 %v856_v49, 320 }
  0xf3   :  { %132 = vbcast.lane.b32.xlu1 %v110_v44, 296  ;;  %152 = vbcast.lane.b32.xlu0 %v110_v44, 336 }
  0xf7   :  { %878 = vbcast.lane.b32.xlu1 %v856_v49, 296  ;;  %898 = vbcast.lane.b32.xlu0 %v856_v49, 336 }
  0xfb   :  { %140 = vbcast.lane.b32.xlu1 %v110_v44, 312  ;;  %160 = vbcast.lane.b32.xlu0 %v110_v44, 352 }
  0xff   :  { %886 = vbcast.lane.b32.xlu1 %v856_v49, 312  ;;  %906 = vbcast.lane.b32.xlu0 %v856_v49, 352 }
 0x103   :  { %148 = vbcast.lane.b32.xlu1 %v110_v44, 328  ;;  %168 = vbcast.lane.b32.xlu0 %v110_v44, 368 }
 0x107   :  { %894 = vbcast.lane.b32.xlu1 %v856_v49, 328  ;;  %914 = vbcast.lane.b32.xlu0 %v856_v49, 368 }
 0x10b   :  { %156 = vbcast.lane.b32.xlu1 %v110_v44, 344  ;;  %179 = vbcast.lane.b32.xlu0 %v2608_v51, 256 }
 0x10f   :  { %902 = vbcast.lane.b32.xlu1 %v856_v49, 344  ;;  %925 = vbcast.lane.b32.xlu0 %v2611_v52, 256 }
 0x113   :  { %164 = vbcast.lane.b32.xlu1 %v110_v44, 360  ;;  %187 = vbcast.lane.b32.xlu0 %v2608_v51, 272 }
 0x117   :  { %910 = vbcast.lane.b32.xlu1 %v856_v49, 360  ;;  %933 = vbcast.lane.b32.xlu0 %v2611_v52, 272 }
 0x11b   :  { %172 = vbcast.lane.b32.xlu1 %v110_v44, 376  ;;  %195 = vbcast.lane.b32.xlu0 %v2608_v51, 288 }
 0x11f   :  { %918 = vbcast.lane.b32.xlu1 %v856_v49, 376  ;;  %941 = vbcast.lane.b32.xlu0 %v2611_v52, 288 }
 0x123   :  { %183 = vbcast.lane.b32.xlu1 %v2608_v51, 264  ;;  %203 = vbcast.lane.b32.xlu0 %v2608_v51, 304 }
 0x127   :  { %929 = vbcast.lane.b32.xlu1 %v2611_v52, 264  ;;  %949 = vbcast.lane.b32.xlu0 %v2611_v52, 304 }
 0x12b   :  { %191 = vbcast.lane.b32.xlu1 %v2608_v51, 280  ;;  %211 = vbcast.lane.b32.xlu0 %v2608_v51, 320 }
 0x12f   :  { %937 = vbcast.lane.b32.xlu1 %v2611_v52, 280  ;;  %957 = vbcast.lane.b32.xlu0 %v2611_v52, 320 }
 0x133   :  { %199 = vbcast.lane.b32.xlu1 %v2608_v51, 296  ;;  %219 = vbcast.lane.b32.xlu0 %v2608_v51, 336 }
 0x137   :  { %945 = vbcast.lane.b32.xlu1 %v2611_v52, 296  ;;  %965 = vbcast.lane.b32.xlu0 %v2611_v52, 336 }
 0x13b   :  { %207 = vbcast.lane.b32.xlu1 %v2608_v51, 312  ;;  %227 = vbcast.lane.b32.xlu0 %v2608_v51, 352 }
 0x13f   :  { %953 = vbcast.lane.b32.xlu1 %v2611_v52, 312  ;;  %973 = vbcast.lane.b32.xlu0 %v2611_v52, 352 }
 0x143   :  { %215 = vbcast.lane.b32.xlu1 %v2608_v51, 328  ;;  %235 = vbcast.lane.b32.xlu0 %v2608_v51, 368 }
 0x147   :  { %961 = vbcast.lane.b32.xlu1 %v2611_v52, 328  ;;  %981 = vbcast.lane.b32.xlu0 %v2611_v52, 368 }
 0x149   :  { %v117_v57 = vpop.permute.xlu1 %116  ;;  %v113_v58 = vpop.permute.xlu0 %112 }
 0x14a   :  { %vm243_vm1 = vcmp.eq.s32.totalorder %v117_v57, %v2635_v53  ;;  %vm241_vm2 = vcmp.eq.s32.totalorder %v113_v58, %v2635_v53  ;;  %vm242_vm3 = vcmp.eq.s32.totalorder %v113_v58, %v2645_v55  ;;  %vm244_vm4 = vcmp.eq.s32.totalorder %v117_v57, %v2645_v55 }
 0x14b   :  { %223 = vbcast.lane.b32.xlu1 %v2608_v51, 344  ;;  %vm1985_vm5 = vmpackc.low %vm244_vm4, %vm242_vm3  ;;  %1704 = vbcast.lane.b32.xlu0 %v2650_v56, 256 }
 0x14c   :  { %1986 = vmatprep.mubr.msk.bf16.mxu0 %vm1985_vm5, %v2531_v59  ;;  %vm1987_vm6 = vmpackc.low %vm243_vm1, %vm241_vm2 }
 0x14d   :  { %v121_v61 = vpop.permute.xlu1 %120  ;;  %1988 = vmatmul.mubr.msk.bf16.vlgmr.msra.gmra.mrb[0].mxu0 %vm1987_vm6, %v2531_v59  ;;  %v129_v62 = vpop.permute.xlu0 %128 }
 0x14e   :  { %vm246_vm7 = vcmp.eq.s32.totalorder %v121_v61, %v2645_v55  ;;  %vm245_vm10 = vcmp.eq.s32.totalorder %v121_v61, %v2635_v53 }
 0x14f   :  { %969 = vbcast.lane.b32.xlu1 %v2611_v52, 344  ;;  %1637 = vbcast.lane.b32.xlu0 %v2661_v60, 256 }
 0x151   :  { %v125_v63 = vpop.permute.xlu1 %124  ;;  %v2666_v0 = vpop.permute.xlu0 %874 }
 0x152   :  { %vm247_vm8 = vcmp.eq.s32.totalorder %v125_v63, %v2635_v53  ;;  %vm248_vm9 = vcmp.eq.s32.totalorder %v125_v63, %v2645_v55 }
 0x153   :  { %vm1989_vm11 = vmpackc.low %vm248_vm9, %vm246_vm7  ;;  %231 = vbcast.lane.b32.xlu1 %v2608_v51, 360  ;;  %1712 = vbcast.lane.b32.xlu0 %v2650_v56, 272 }
 0x154   :  { %vm1991_vm12 = vmpackc.low %vm247_vm8, %vm245_vm10  ;;  %1990 = vmatprep.mubr.msk.bf16.mxu0 %vm1989_vm11, %v2531_v59  ;;  %vm250_vm10 = vcmp.eq.s32.totalorder %v129_v62, %v2645_v55 }
 0x155   :  { %v859_v1 = vpop.permute.xlu1 %858  ;;  %1992 = vmatmul.mubr.msk.bf16.gmra.mrb[4].mxu0 %vm1991_vm12, %v2531_v59  ;;  %v2676_v2 = vpop.permute.xlu0 %136 }
 0x156   :  { %vm987_vm13 = vcmp.eq.s32.totalorder %v859_v1, %v2635_v53  ;;  %vm988_vm2 = vcmp.eq.s32.totalorder %v859_v1, %v2645_v55 }
 0x157   :  { %977 = vbcast.lane.b32.xlu1 %v2611_v52, 360  ;;  %1716 = vbcast.lane.b32.xlu0 %v2650_v56, 280 }
 0x159   :  { %v863_v3 = vpop.permute.xlu1 %862  ;;  %v2680_v4 = vpop.permute.xlu0 %882 }
 0x15a   :  { %vm989_vm14 = vcmp.eq.s32.totalorder %v863_v3, %v2635_v53  ;;  %vm990_vm15 = vcmp.eq.s32.totalorder %v863_v3, %v2645_v55 }
 0x15b   :  { %vm2132_vm1 = vmpackc.low %vm989_vm14, %vm987_vm13  ;;  %239 = vbcast.lane.b32.xlu1 %v2608_v51, 376  ;;  %1720 = vbcast.lane.b32.xlu0 %v2650_v56, 288  ;;  %vm249_vm13 = vcmp.eq.s32.totalorder %v129_v62, %v2635_v53 }
 0x15c   :  { %vm2130_vm3 = vmpackc.low %vm990_vm15, %vm988_vm2 }
 0x15d   :  { %2131 = vmatprep.mubr.msk.bf16.mxu1 %vm2130_vm3, %v2531_v59  ;;  %v867_v5 = vpop.permute.xlu1 %866  ;;  %v2689_v6 = vpop.permute.xlu0 %144 }
 0x15e   :  { %2133 = vmatmul.mubr.msk.bf16.vlgmr.msra.gmra.mrb[0].mxu1 %vm2132_vm1, %v2531_v59  ;;  %vm992_vm4 = vcmp.eq.s32.totalorder %v867_v5, %v2645_v55  ;;  %vm991_vm7 = vcmp.eq.s32.totalorder %v867_v5, %v2635_v53  ;;  %vm996_vm1 = vcmp.eq.s32.totalorder %v2666_v0, %v2645_v55 }
 0x15f   :  { %985 = vbcast.lane.b32.xlu1 %v2611_v52, 376  ;;  %1724 = vbcast.lane.b32.xlu0 %v2650_v56, 296 }
 0x161   :  { %v871_v7 = vpop.permute.xlu1 %870  ;;  %v2694_v8 = vpop.permute.xlu0 %890 }
 0x162   :  { %vm993_vm5 = vcmp.eq.s32.totalorder %v871_v7, %v2635_v53  ;;  %vm994_vm6 = vcmp.eq.s32.totalorder %v871_v7, %v2645_v55 }
 0x163   :  { %vm2134_vm8 = vmpackc.low %vm994_vm6, %vm992_vm4  ;;  %1708 = vbcast.lane.b32.xlu1 %v2650_v56, 264  ;;  %1728 = vbcast.lane.b32.xlu0 %v2650_v56, 304  ;;  %vm995_vm4 = vcmp.eq.s32.totalorder %v2666_v0, %v2635_v53 }
 0x164   :  { %vm2136_vm9 = vmpackc.low %vm993_vm5, %vm991_vm7  ;;  %2135 = vmatprep.mubr.msk.bf16.mxu1 %vm2134_vm8, %v2531_v59  ;;  %vm254_vm7 = vcmp.eq.s32.totalorder %v2676_v2, %v2645_v55 }
 0x165   :  { %v133_v9 = vpop.permute.xlu1 %132  ;;  %v2703_v10 = vpop.permute.xlu0 %152 }
 0x166   :  { %2137 = vmatmul.mubr.msk.bf16.gmra.mrb[4].mxu1 %vm2136_vm9, %v2531_v59  ;;  %vm251_vm11 = vcmp.eq.s32.totalorder %v133_v9, %v2635_v53  ;;  %vm252_vm12 = vcmp.eq.s32.totalorder %v133_v9, %v2645_v55 }
 0x167   :  { %vm1993_vm14 = vmpackc.low %vm252_vm12, %vm250_vm10  ;;  %1641 = vbcast.lane.b32.xlu1 %v2661_v60, 264  ;;  %1732 = vbcast.lane.b32.xlu0 %v2650_v56, 312  ;;  %vm253_vm10 = vcmp.eq.s32.totalorder %v2676_v2, %v2635_v53 }
 0x168   :  { %vm1995_vm15 = vmpackc.low %vm251_vm11, %vm249_vm13  ;;  %1994 = vmatprep.mubr.msk.bf16.mxu0 %vm1993_vm14, %v2531_v59  ;;  %vm1000_vm13 = vcmp.eq.s32.totalorder %v2680_v4, %v2645_v55 }
 0x169   :  { %v879_v11 = vpop.permute.xlu1 %878  ;;  %1996 = vmatmul.mubr.msk.bf16.gmra.mrb[8].mxu0 %vm1995_vm15, %v2531_v59  ;;  %v2714_v12 = vpop.permute.xlu0 %898 }
 0x16a   :  { %vm997_vm2 = vcmp.eq.s32.totalorder %v879_v11, %v2635_v53  ;;  %vm998_vm3 = vcmp.eq.s32.totalorder %v879_v11, %v2645_v55 }
 0x16b   :  { %vm2138_vm5 = vmpackc.low %vm998_vm3, %vm996_vm1  ;;  %1645 = vbcast.lane.b32.xlu1 %v2661_v60, 272  ;;  %1736 = vbcast.lane.b32.xlu0 %v2650_v56, 320  ;;  %vm999_vm1 = vcmp.eq.s32.totalorder %v2680_v4, %v2635_v53 }
 0x16c   :  { %vm2140_vm6 = vmpackc.low %vm997_vm2, %vm995_vm4  ;;  %2139 = vmatprep.mubr.msk.bf16.mxu1 %vm2138_vm5, %v2531_v59  ;;  %vm258_vm4 = vcmp.eq.s32.totalorder %v2689_v6, %v2645_v55 }
 0x16d   :  { %v141_v13 = vpop.permute.xlu1 %140  ;;  %v2725_v14 = vpop.permute.xlu0 %160 }
 0x16e   :  { %vm255_vm8 = vcmp.eq.s32.totalorder %v141_v13, %v2635_v53  ;;  %vm256_vm9 = vcmp.eq.s32.totalorder %v141_v13, %v2645_v55  ;;  %2141 = vmatmul.mubr.msk.bf16.gmra.mrb[8].mxu1 %vm2140_vm6, %v2531_v59 }
 0x16f   :  { %vm1997_vm11 = vmpackc.low %vm256_vm9, %vm254_vm7  ;;  %1649 = vbcast.lane.b32.xlu1 %v2661_v60, 280  ;;  %1669 = vbcast.lane.b32.xlu0 %v2661_v60, 320  ;;  %vm257_vm7 = vcmp.eq.s32.totalorder %v2689_v6, %v2635_v53 }
 0x170   :  { %vm1999_vm12 = vmpackc.low %vm255_vm8, %vm253_vm10  ;;  %1998 = vmatprep.mubr.msk.bf16.mxu0 %vm1997_vm11, %v2531_v59  ;;  %vm1004_vm10 = vcmp.eq.s32.totalorder %v2694_v8, %v2645_v55 }
 0x171   :  { %v887_v15 = vpop.permute.xlu1 %886  ;;  %2000 = vmatmul.mubr.msk.bf16.gmra.mrb[12].mxu0 %vm1999_vm12, %v2531_v59  ;;  %v2738_v16 = vpop.permute.xlu0 %906 }
 0x172   :  { %vm1001_vm14 = vcmp.eq.s32.totalorder %v887_v15, %v2635_v53  ;;  %vm1002_vm15 = vcmp.eq.s32.totalorder %v887_v15, %v2645_v55 }
 0x173   :  { %vm2142_vm2 = vmpackc.low %vm1002_vm15, %vm1000_vm13  ;;  %1653 = vbcast.lane.b32.xlu1 %v2661_v60, 288  ;;  %1740 = vbcast.lane.b32.xlu0 %v2650_v56, 328  ;;  %vm1003_vm13 = vcmp.eq.s32.totalorder %v2694_v8, %v2635_v53 }
 0x174   :  { %vm2144_vm3 = vmpackc.low %vm1001_vm14, %vm999_vm1  ;;  %2143 = vmatprep.mubr.msk.bf16.mxu1 %vm2142_vm2, %v2531_v59  ;;  %vm262_vm1 = vcmp.eq.s32.totalorder %v2703_v10, %v2645_v55 }
 0x175   :  { %v149_v17 = vpop.permute.xlu1 %148  ;;  %v2749_v18 = vpop.permute.xlu0 %168 }
 0x176   :  { %vm259_vm5 = vcmp.eq.s32.totalorder %v149_v17, %v2635_v53  ;;  %vm260_vm6 = vcmp.eq.s32.totalorder %v149_v17, %v2645_v55  ;;  %2145 = vmatmul.mubr.msk.bf16.gmra.mrb[12].mxu1 %vm2144_vm3, %v2531_v59 }
 0x177   :  { %vm2001_vm8 = vmpackc.low %vm260_vm6, %vm258_vm4  ;;  %1657 = vbcast.lane.b32.xlu1 %v2661_v60, 296  ;;  %1673 = vbcast.lane.b32.xlu0 %v2661_v60, 328  ;;  %vm261_vm4 = vcmp.eq.s32.totalorder %v2703_v10, %v2635_v53 }
 0x178   :  { %vm2003_vm9 = vmpackc.low %vm259_vm5, %vm257_vm7  ;;  %2002 = vmatprep.mubr.msk.bf16.mxu0 %vm2001_vm8, %v2531_v59  ;;  %vm1008_vm7 = vcmp.eq.s32.totalorder %v2714_v12, %v2645_v55 }
 0x179   :  { %v895_v19 = vpop.permute.xlu1 %894  ;;  %2004 = vmatmul.mubr.msk.bf16.gmra.mrb[16].mxu0 %vm2003_vm9, %v2531_v59  ;;  %v2762_v20 = vpop.permute.xlu0 %914 }
 0x17a   :  { %vm1005_vm11 = vcmp.eq.s32.totalorder %v895_v19, %v2635_v53  ;;  %vm1006_vm12 = vcmp.eq.s32.totalorder %v895_v19, %v2645_v55 }
 0x17b   :  { %vm2146_vm14 = vmpackc.low %vm1006_vm12, %vm1004_vm10  ;;  %1661 = vbcast.lane.b32.xlu1 %v2661_v60, 304  ;;  %1744 = vbcast.lane.b32.xlu0 %v2650_v56, 336  ;;  %vm1007_vm10 = vcmp.eq.s32.totalorder %v2714_v12, %v2635_v53 }
 0x17c   :  { %vm2148_vm15 = vmpackc.low %vm1005_vm11, %vm1003_vm13  ;;  %2147 = vmatprep.mubr.msk.bf16.mxu1 %vm2146_vm14, %v2531_v59  ;;  %vm266_vm13 = vcmp.eq.s32.totalorder %v2725_v14, %v2645_v55 }
 0x17d   :  { %v157_v21 = vpop.permute.xlu1 %156  ;;  %v2773_v22 = vpop.permute.xlu0 %179 }
 0x17e   :  { %vm263_vm2 = vcmp.eq.s32.totalorder %v157_v21, %v2635_v53  ;;  %vm264_vm3 = vcmp.eq.s32.totalorder %v157_v21, %v2645_v55  ;;  %2149 = vmatmul.mubr.msk.bf16.gmra.mrb[16].mxu1 %vm2148_vm15, %v2531_v59 }
 0x17f   :  { %vm2005_vm5 = vmpackc.low %vm264_vm3, %vm262_vm1  ;;  %1665 = vbcast.lane.b32.xlu1 %v2661_v60, 312  ;;  %1677 = vbcast.lane.b32.xlu0 %v2661_v60, 336  ;;  %vm265_vm1 = vcmp.eq.s32.totalorder %v2725_v14, %v2635_v53 }
 0x180   :  { %vm2007_vm6 = vmpackc.low %vm263_vm2, %vm261_vm4  ;;  %2006 = vmatprep.mubr.msk.bf16.mxu0 %vm2005_vm5, %v2531_v59  ;;  %vm1012_vm4 = vcmp.eq.s32.totalorder %v2738_v16, %v2645_v55 }
 0x181   :  { %v903_v23 = vpop.permute.xlu1 %902  ;;  %2008 = vmatmul.mubr.msk.bf16.gmra.mrb[20].mxu0 %vm2007_vm6, %v2531_v59  ;;  %v2786_v24 = vpop.permute.xlu0 %925 }
 0x182   :  { %vm1009_vm8 = vcmp.eq.s32.totalorder %v903_v23, %v2635_v53  ;;  %vm1010_vm9 = vcmp.eq.s32.totalorder %v903_v23, %v2645_v55 }
 0x183   :  { %vm2150_vm11 = vmpackc.low %vm1010_vm9, %vm1008_vm7  ;;  %1748 = vbcast.lane.b32.xlu0 %v2650_v56, 344  ;;  %vm1011_vm7 = vcmp.eq.s32.totalorder %v2738_v16, %v2635_v53 }
 0x184   :  { %vm2152_vm12 = vmpackc.low %vm1009_vm8, %vm1007_vm10  ;;  %2151 = vmatprep.mubr.msk.bf16.mxu1 %vm2150_vm11, %v2531_v59  ;;  %vm270_vm10 = vcmp.eq.s32.totalorder %v2749_v18, %v2645_v55 }
 0x185   :  { %v165_v25 = vpop.permute.xlu1 %164  ;;  %v2796_v26 = vpop.permute.xlu0 %187 }
 0x186   :  { %vm267_vm14 = vcmp.eq.s32.totalorder %v165_v25, %v2635_v53  ;;  %vm268_vm15 = vcmp.eq.s32.totalorder %v165_v25, %v2645_v55  ;;  %2153 = vmatmul.mubr.msk.bf16.gmra.mrb[20].mxu1 %vm2152_vm12, %v2531_v59 }
 0x187   :  { %vm2009_vm2 = vmpackc.low %vm268_vm15, %vm266_vm13  ;;  %1681 = vbcast.lane.b32.xlu0 %v2661_v60, 344  ;;  %vm269_vm13 = vcmp.eq.s32.totalorder %v2749_v18, %v2635_v53 }
 0x188   :  { %vm2011_vm3 = vmpackc.low %vm267_vm14, %vm265_vm1  ;;  %2010 = vmatprep.mubr.msk.bf16.mxu0 %vm2009_vm2, %v2531_v59  ;;  %vm1016_vm1 = vcmp.eq.s32.totalorder %v2762_v20, %v2645_v55 }
 0x189   :  { %v911_v27 = vpop.permute.xlu1 %910  ;;  %2012 = vmatmul.mubr.msk.bf16.gmra.mrb[24].mxu0 %vm2011_vm3, %v2531_v59  ;;  %v2808_v28 = vpop.permute.xlu0 %933 }
 0x18a   :  { %vm1013_vm5 = vcmp.eq.s32.totalorder %v911_v27, %v2635_v53  ;;  %vm1014_vm6 = vcmp.eq.s32.totalorder %v911_v27, %v2645_v55 }
 0x18b   :  { %vm2154_vm8 = vmpackc.low %vm1014_vm6, %vm1012_vm4  ;;  %1752 = vbcast.lane.b32.xlu0 %v2650_v56, 352  ;;  %vm1015_vm4 = vcmp.eq.s32.totalorder %v2762_v20, %v2635_v53 }
 0x18c   :  { %vm2156_vm9 = vmpackc.low %vm1013_vm5, %vm1011_vm7  ;;  %2155 = vmatprep.mubr.msk.bf16.mxu1 %vm2154_vm8, %v2531_v59  ;;  %vm274_vm7 = vcmp.eq.s32.totalorder %v2773_v22, %v2645_v55 }
 0x18d   :  { %v173_v29 = vpop.permute.xlu1 %172  ;;  %v2818_v30 = vpop.permute.xlu0 %195 }
 0x18e   :  { %vm271_vm11 = vcmp.eq.s32.totalorder %v173_v29, %v2635_v53  ;;  %vm272_vm12 = vcmp.eq.s32.totalorder %v173_v29, %v2645_v55  ;;  %2157 = vmatmul.mubr.msk.bf16.gmra.mrb[24].mxu1 %vm2156_vm9, %v2531_v59 }
 0x18f   :  { %vm2013_vm14 = vmpackc.low %vm272_vm12, %vm270_vm10  ;;  %1685 = vbcast.lane.b32.xlu0 %v2661_v60, 352  ;;  %vm273_vm10 = vcmp.eq.s32.totalorder %v2773_v22, %v2635_v53 }
 0x190   :  { %vm2015_vm15 = vmpackc.low %vm271_vm11, %vm269_vm13  ;;  %2014 = vmatprep.mubr.msk.bf16.mxu0 %vm2013_vm14, %v2531_v59  ;;  %vm1020_vm13 = vcmp.eq.s32.totalorder %v2786_v24, %v2645_v55 }
 0x191   :  { %v919_v31 = vpop.permute.xlu1 %918  ;;  %2016 = vmatmul.mubr.msk.bf16.gmra.mrb[28].mxu0 %vm2015_vm15, %v2531_v59  ;;  %v2836_v32 = vpop.permute.xlu0 %941 }
 0x192   :  { %vm1017_vm2 = vcmp.eq.s32.totalorder %v919_v31, %v2635_v53  ;;  %vm1018_vm3 = vcmp.eq.s32.totalorder %v919_v31, %v2645_v55 }
 0x193   :  { %vm2158_vm5 = vmpackc.low %vm1018_vm3, %vm1016_vm1  ;;  %1689 = vbcast.lane.b32.xlu0 %v2661_v60, 360  ;;  %vm1019_vm1 = vcmp.eq.s32.totalorder %v2786_v24, %v2635_v53 }
 0x194   :  { %vm2160_vm6 = vmpackc.low %vm1017_vm2, %vm1015_vm4  ;;  %2159 = vmatprep.mubr.msk.bf16.mxu1 %vm2158_vm5, %v2531_v59  ;;  %vm278_vm4 = vcmp.eq.s32.totalorder %v2796_v26, %v2645_v55 }
 0x195   :  { %v184_v33 = vpop.permute.xlu1 %183  ;;  %v204_v34 = vpop.permute.xlu0 %203 }
 0x196   :  { %vm275_vm8 = vcmp.eq.s32.totalorder %v184_v33, %v2635_v53  ;;  %vm276_vm9 = vcmp.eq.s32.totalorder %v184_v33, %v2645_v55  ;;  %2161 = vmatmul.mubr.msk.bf16.gmra.mrb[28].mxu1 %vm2160_vm6, %v2531_v59 }
 0x197   :  { %vm2017_vm11 = vmpackc.low %vm276_vm9, %vm274_vm7  ;;  %1760 = vbcast.lane.b32.xlu0 %v2650_v56, 368  ;;  %vm277_vm7 = vcmp.eq.s32.totalorder %v2796_v26, %v2635_v53 }
 0x198   :  { %vm2019_vm12 = vmpackc.low %vm275_vm8, %vm273_vm10  ;;  %2018 = vmatprep.mubr.msk.bf16.mxu0 %vm2017_vm11, %v2531_v59  ;;  %vm1024_vm10 = vcmp.eq.s32.totalorder %v2808_v28, %v2645_v55 }
 0x199   :  { %v930_v35 = vpop.permute.xlu1 %929  ;;  %2020 = vmatmul.mubr.msk.bf16.gmra.mrb[32].mxu0 %vm2019_vm12, %v2531_v59  ;;  %v950_v37 = vpop.permute.xlu0 %949 }
 0x19a   :  { %vm1021_vm14 = vcmp.eq.s32.totalorder %v930_v35, %v2635_v53  ;;  %vm1022_vm15 = vcmp.eq.s32.totalorder %v930_v35, %v2645_v55 }
 0x19b   :  { %vm2162_vm2 = vmpackc.low %vm1022_vm15, %vm1020_vm13  ;;  %1693 = vbcast.lane.b32.xlu0 %v2661_v60, 368  ;;  %vm1023_vm13 = vcmp.eq.s32.totalorder %v2808_v28, %v2635_v53 }
 0x19c   :  { %vm2164_vm3 = vmpackc.low %vm1021_vm14, %vm1019_vm1  ;;  %2163 = vmatprep.mubr.msk.bf16.mxu1 %vm2162_vm2, %v2531_v59  ;;  %vm282_vm1 = vcmp.eq.s32.totalorder %v2818_v30, %v2645_v55 }
 0x19d   :  { %v192_v36 = vpop.permute.xlu1 %191  ;;  %v212_v40 = vpop.permute.xlu0 %211 }
 0x19e   :  { %vm279_vm5 = vcmp.eq.s32.totalorder %v192_v36, %v2635_v53  ;;  %vm280_vm6 = vcmp.eq.s32.totalorder %v192_v36, %v2645_v55  ;;  %2165 = vmatmul.mubr.msk.bf16.gmra.mrb[32].mxu1 %vm2164_vm3, %v2531_v59 }
 0x19f   :  { %vm2021_vm8 = vmpackc.low %vm280_vm6, %vm278_vm4  ;;  %1764 = vbcast.lane.b32.xlu0 %v2650_v56, 376  ;;  %vm281_vm4 = vcmp.eq.s32.totalorder %v2818_v30, %v2635_v53 }
 0x1a0   :  { %vm2023_vm9 = vmpackc.low %vm279_vm5, %vm277_vm7  ;;  %2022 = vmatprep.mubr.msk.bf16.mxu0 %vm2021_vm8, %v2531_v59  ;;  %vm1028_vm7 = vcmp.eq.s32.totalorder %v2836_v32, %v2645_v55 }
 0x1a1   :  { %v938_v39 = vpop.permute.xlu1 %937  ;;  %2024 = vmatmul.mubr.msk.bf16.gmra.mrb[36].mxu0 %vm2023_vm9, %v2531_v59  ;;  %v958_v43 = vpop.permute.xlu0 %957 }
 0x1a2   :  { %vm1025_vm11 = vcmp.eq.s32.totalorder %v938_v39, %v2635_v53  ;;  %vm1026_vm12 = vcmp.eq.s32.totalorder %v938_v39, %v2645_v55 }
 0x1a3   :  { %vm2166_vm14 = vmpackc.low %vm1026_vm12, %vm1024_vm10  ;;  %1842 = vadd.xlane.f32.xlu1 %v1841_v38  ;;  %vm1027_vm10 = vcmp.eq.s32.totalorder %v2836_v32, %v2635_v53 }
 0x1a4   :  { %vm2168_vm15 = vmpackc.low %vm1025_vm11, %vm1023_vm13  ;;  %2167 = vmatprep.mubr.msk.bf16.mxu1 %vm2166_vm14, %v2531_v59  ;;  %vm286_vm13 = vcmp.eq.s32.totalorder %v204_v34, %v2645_v55 }
 0x1a5   :  { %v200_v41 = vpop.permute.xlu1 %199  ;;  %v220_v45 = vpop.permute.xlu0 %219 }
 0x1a6   :  { %vm283_vm2 = vcmp.eq.s32.totalorder %v200_v41, %v2635_v53  ;;  %vm284_vm3 = vcmp.eq.s32.totalorder %v200_v41, %v2645_v55  ;;  %2169 = vmatmul.mubr.msk.bf16.gmra.mrb[36].mxu1 %vm2168_vm15, %v2531_v59 }
 0x1a7   :  { %vm2025_vm5 = vmpackc.low %vm284_vm3, %vm282_vm1  ;;  %vm285_vm1 = vcmp.eq.s32.totalorder %v204_v34, %v2635_v53 }
 0x1a8   :  { %vm2027_vm6 = vmpackc.low %vm283_vm2, %vm281_vm4  ;;  %2026 = vmatprep.mubr.msk.bf16.mxu0 %vm2025_vm5, %v2531_v59  ;;  %vm1032_vm4 = vcmp.eq.s32.totalorder %v950_v37, %v2645_v55 }
 0x1a9   :  { %v946_v42 = vpop.permute.xlu1 %945  ;;  %2028 = vmatmul.mubr.msk.bf16.gmra.mrb[40].mxu0 %vm2027_vm6, %v2531_v59  ;;  %v966_v48 = vpop.permute.xlu0 %965 }
 0x1aa   :  { %vm1029_vm8 = vcmp.eq.s32.totalorder %v946_v42, %v2635_v53  ;;  %vm1030_vm9 = vcmp.eq.s32.totalorder %v946_v42, %v2645_v55 }
 0x1ab   :  { %vm2170_vm11 = vmpackc.low %vm1030_vm9, %vm1028_vm7  ;;  %vm1031_vm7 = vcmp.eq.s32.totalorder %v950_v37, %v2635_v53 }
 0x1ac   :  { %vm2172_vm12 = vmpackc.low %vm1029_vm8, %vm1027_vm10  ;;  %2171 = vmatprep.mubr.msk.bf16.mxu1 %vm2170_vm11, %v2531_v59  ;;  %vm290_vm10 = vcmp.eq.s32.totalorder %v212_v40, %v2645_v55 }
 0x1ad   :  { %v208_v44 = vpop.permute.xlu1 %207  ;;  %v228_v50 = vpop.permute.xlu0 %227 }
 0x1ae   :  { %vm287_vm14 = vcmp.eq.s32.totalorder %v208_v44, %v2635_v53  ;;  %vm288_vm15 = vcmp.eq.s32.totalorder %v208_v44, %v2645_v55  ;;  %2173 = vmatmul.mubr.msk.bf16.gmra.mrb[40].mxu1 %vm2172_vm12, %v2531_v59 }
 0x1af   :  { %vm2029_vm2 = vmpackc.low %vm288_vm15, %vm286_vm13  ;;  %vm289_vm13 = vcmp.eq.s32.totalorder %v212_v40, %v2635_v53 }
 0x1b0   :  { %vm2031_vm3 = vmpackc.low %vm287_vm14, %vm285_vm1  ;;  %2030 = vmatprep.mubr.msk.bf16.mxu0 %vm2029_vm2, %v2531_v59  ;;  %vm1036_vm1 = vcmp.eq.s32.totalorder %v958_v43, %v2645_v55 }
 0x1b1   :  { %v954_v46 = vpop.permute.xlu1 %953  ;;  %2032 = vmatmul.mubr.msk.bf16.gmra.mrb[44].mxu0 %vm2031_vm3, %v2531_v59  ;;  %v974_v54 = vpop.permute.xlu0 %973 }
 0x1b2   :  { %vm1033_vm5 = vcmp.eq.s32.totalorder %v954_v46, %v2635_v53  ;;  %vm1034_vm6 = vcmp.eq.s32.totalorder %v954_v46, %v2645_v55 }
 0x1b3   :  { %vm2174_vm8 = vmpackc.low %vm1034_vm6, %vm1032_vm4  ;;  %vm1035_vm4 = vcmp.eq.s32.totalorder %v958_v43, %v2635_v53 }
 0x1b4   :  { %vm2176_vm9 = vmpackc.low %vm1033_vm5, %vm1031_vm7  ;;  %2175 = vmatprep.mubr.msk.bf16.mxu1 %vm2174_vm8, %v2531_v59  ;;  %1756 = vbcast.lane.b32.xlu1 %v2650_v56, 360  ;;  %vm294_vm7 = vcmp.eq.s32.totalorder %v220_v45, %v2645_v55 }
 0x1b5   :  { %v216_v47 = vpop.permute.xlu1 %215  ;;  %v236_v57 = vpop.permute.xlu0 %235 }
 0x1b6   :  { %vm291_vm11 = vcmp.eq.s32.totalorder %v216_v47, %v2635_v53  ;;  %vm292_vm12 = vcmp.eq.s32.totalorder %v216_v47, %v2645_v55  ;;  %2177 = vmatmul.mubr.msk.bf16.gmra.mrb[44].mxu1 %vm2176_vm9, %v2531_v59 }
 0x1b7   :  { %vm2033_vm14 = vmpackc.low %vm292_vm12, %vm290_vm10  ;;  %vm293_vm10 = vcmp.eq.s32.totalorder %v220_v45, %v2635_v53 }
 0x1b8   :  { %vm2035_vm15 = vmpackc.low %vm291_vm11, %vm289_vm13  ;;  %2034 = vmatprep.mubr.msk.bf16.mxu0 %vm2033_vm14, %v2531_v59  ;;  %1697 = vbcast.lane.b32.xlu1 %v2661_v60, 376  ;;  %vm1040_vm13 = vcmp.eq.s32.totalorder %v966_v48, %v2645_v55 }
 0x1b9   :  { %v962_v49 = vpop.permute.xlu1 %961  ;;  %2036 = vmatmul.mubr.msk.bf16.gmra.mrb[48].mxu0 %vm2035_vm15, %v2531_v59  ;;  %v982_v61 = vpop.permute.xlu0 %981 }
 0x1ba   :  { %vm1037_vm2 = vcmp.eq.s32.totalorder %v962_v49, %v2635_v53  ;;  %vm1038_vm3 = vcmp.eq.s32.totalorder %v962_v49, %v2645_v55 }
 0x1bb   :  { %vm2178_vm5 = vmpackc.low %vm1038_vm3, %vm1036_vm1  ;;  %vm1039_vm1 = vcmp.eq.s32.totalorder %v966_v48, %v2635_v53 }
 0x1bc   :  { %vm2180_vm6 = vmpackc.low %vm1037_vm2, %vm1035_vm4  ;;  %2179 = vmatprep.mubr.msk.bf16.mxu1 %vm2178_vm5, %v2531_v59  ;;  %vm298_vm4 = vcmp.eq.s32.totalorder %v228_v50, %v2645_v55 }
 0x1bd   :  { %v224_v51 = vpop.permute.xlu1 %223  ;;  %v2956_v63 = vpop.permute.xlu0 %1704 }
 0x1be   :  { %vm295_vm8 = vcmp.eq.s32.totalorder %v224_v51, %v2635_v53  ;;  %vm296_vm9 = vcmp.eq.s32.totalorder %v224_v51, %v2645_v55  ;;  %2181 = vmatmul.mubr.msk.bf16.gmra.mrb[48].mxu1 %vm2180_vm6, %v2531_v59 }
 0x1bf   :  { %vm2037_vm11 = vmpackc.low %vm296_vm9, %vm294_vm7  ;;  %vm297_vm7 = vcmp.eq.s32.totalorder %v228_v50, %v2635_v53 }
 0x1c0   :  { %vm2039_vm12 = vmpackc.low %vm295_vm8, %vm293_vm10  ;;  %2038 = vmatprep.mubr.msk.bf16.mxu0 %vm2037_vm11, %v2531_v59  ;;  %vm1044_vm10 = vcmp.eq.s32.totalorder %v974_v54, %v2645_v55 }
 0x1c1   :  { %v970_v52 = vpop.permute.xlu1 %969  ;;  %2040 = vmatmul.mubr.msk.bf16.gmra.mrb[52].mxu0 %vm2039_vm12, %v2531_v59  ;;  %v1638_v0 = vpop.permute.xlu0 %1637 }
 0x1c2   :  { %vm1041_vm14 = vcmp.eq.s32.totalorder %v970_v52, %v2635_v53  ;;  %vm1042_vm15 = vcmp.eq.s32.totalorder %v970_v52, %v2645_v55 }
 0x1c3   :  { %vm2182_vm2 = vmpackc.low %vm1042_vm15, %vm1040_vm13  ;;  %vm1043_vm13 = vcmp.eq.s32.totalorder %v974_v54, %v2635_v53 }
 0x1c4   :  { %vm2184_vm3 = vmpackc.low %vm1041_vm14, %vm1039_vm1  ;;  %2183 = vmatprep.mubr.msk.bf16.mxu1 %vm2182_vm2, %v2531_v59  ;;  %vm302_vm1 = vcmp.eq.s32.totalorder %v236_v57, %v2645_v55 }
 0x1c5   :  { %v232_v56 = vpop.permute.xlu1 %231  ;;  %v2958_v1 = vpop.permute.xlu0 %1712 }
 0x1c6   :  { %vm299_vm5 = vcmp.eq.s32.totalorder %v232_v56, %v2635_v53  ;;  %vm300_vm6 = vcmp.eq.s32.totalorder %v232_v56, %v2645_v55  ;;  %2185 = vmatmul.mubr.msk.bf16.gmra.mrb[52].mxu1 %vm2184_vm3, %v2531_v59 }
 0x1c7   :  { %vm2041_vm8 = vmpackc.low %vm300_vm6, %vm298_vm4  ;;  %vm301_vm4 = vcmp.eq.s32.totalorder %v236_v57, %v2635_v53 }
 0x1c8   :  { %vm2043_vm9 = vmpackc.low %vm299_vm5, %vm297_vm7  ;;  %2042 = vmatprep.mubr.msk.bf16.mxu0 %vm2041_vm8, %v2531_v59  ;;  %vm1048_vm7 = vcmp.eq.s32.totalorder %v982_v61, %v2645_v55 }
 0x1c9   :  { %v978_v58 = vpop.permute.xlu1 %977  ;;  %2044 = vmatmul.mubr.msk.bf16.gmra.mrb[56].mxu0 %vm2043_vm9, %v2531_v59  ;;  %v2960_v2 = vpop.permute.xlu0 %1716 }
 0x1ca   :  { %vm1045_vm11 = vcmp.eq.s32.totalorder %v978_v58, %v2635_v53  ;;  %vm1046_vm12 = vcmp.eq.s32.totalorder %v978_v58, %v2645_v55 }
 0x1cb   :  { %vm2186_vm14 = vmpackc.low %vm1046_vm12, %vm1044_vm10  ;;  %vm1047_vm10 = vcmp.eq.s32.totalorder %v982_v61, %v2635_v53 }
 0x1cc   :  { %vm2188_vm15 = vmpackc.low %vm1045_vm11, %vm1043_vm13  ;;  %2187 = vmatprep.mubr.msk.bf16.mxu1 %vm2186_vm14, %v2531_v59  ;;  %vm1874_vm13 = vcmask 1041409  }
 0x1cd   :  { %v240_v60 = vpop.permute.xlu1 %239  ;;  %v2962_v3 = vpop.permute.xlu0 %1720 }
 0x1ce   :  { %vm303_vm2 = vcmp.eq.s32.totalorder %v240_v60, %v2635_v53  ;;  %vm304_vm3 = vcmp.eq.s32.totalorder %v240_v60, %v2645_v55  ;;  %2189 = vmatmul.mubr.msk.bf16.gmra.mrb[56].mxu1 %vm2188_vm15, %v2531_v59 }
 0x1cf   :  { %vm2045_vm5 = vmpackc.low %vm304_vm3, %vm302_vm1 }
 0x1d0   :  { %vm2047_vm6 = vmpackc.low %vm303_vm2, %vm301_vm4  ;;  %2046 = vmatprep.mubr.msk.bf16.mxu0 %vm2045_vm5, %v2531_v59 }
 0x1d1   :  { %v986_v62 = vpop.permute.xlu1 %985  ;;  %2048 = vmatmul.mubr.msk.bf16.gmra.mrb[60].mxu0 %vm2047_vm6, %v2531_v59  ;;  %v2964_v4 = vpop.permute.xlu0 %1724 }
 0x1d2   :  { %vm1049_vm8 = vcmp.eq.s32.totalorder %v986_v62, %v2635_v53  ;;  %vm1050_vm9 = vcmp.eq.s32.totalorder %v986_v62, %v2645_v55 }
 0x1d3   :  { %vm2190_vm11 = vmpackc.low %vm1050_vm9, %vm1048_vm7 }
 0x1d4   :  { %vm2192_vm12 = vmpackc.low %vm1049_vm8, %vm1047_vm10  ;;  %2191 = vmatprep.mubr.msk.bf16.mxu1 %vm2190_vm11, %v2531_v59 }
 0x1d5   :  { %v2966_v55 = vpop.permute.xlu0 %1728 }
 0x1d6   :  { %2193 = vmatmul.mubr.msk.bf16.gmra.mrb[60].mxu1 %vm2192_vm12, %v2531_v59  ;;  %v2970_v59 = vpop.permute.xlu1 %1708 }
 0x1d9   :  { %v2968_v53 = vpop.permute.xlu0 %1732 }
 0x1da   :  { %v1642_v13 = vpop.permute.xlu1 %1641 }
 0x1dd   :  { %v2972_v10 = vpop.permute.xlu0 %1736 }
 0x1de   :  { %v1646_v20 = vpop.permute.xlu1 %1645 }
 0x1e1   :  { %v2974_v15 = vpop.permute.xlu0 %1669 }
 0x1e2   :  { %v1650_v27 = vpop.permute.xlu1 %1649 }
 0x1e5   :  { %v2976_v21 = vpop.permute.xlu0 %1740 }
 0x1e6   :  { %v1654_v36 = vpop.permute.xlu1 %1653 }
 0x1e9   :  { %v2978_v30 = vpop.permute.xlu0 %1673 }
 0x1ea   :  { %v1658_v60 = vpop.permute.xlu1 %1657 }
 0x1ed   :  { %v2980_v40 = vpop.permute.xlu0 %1744 }
 0x1f1   :  { %v2982_v57 = vpop.permute.xlu0 %1677 }
 0x220   :  { %v2211_v5 = vpop.f32.mrb[0].mxu0 }
 0x221   :  { %v2212_v6 = vpop.f32.mrb[1].mxu0 }
 0x222   :  { %v2213_v7 = vadd.f32 %v2212_v6, %v2211_v5  ;;  %v2214_v8 = vpop.f32.mrb[2].mxu0 }
 0x223   :  { %v2215_v9 = vpop.f32.mrb[3].mxu0 }
 0x224   :  { %v2216_v11 = vadd.f32 %v2215_v9, %v2214_v8 }
 0x228   :  { %v2217_v12 = vpop.f32.mrb[4].mxu0 }
 0x229   :  { %v2218_v14 = vpop.f32.mrb[5].mxu0 }
 0x22a   :  { %v2219_v16 = vadd.f32 %v2218_v14, %v2217_v12  ;;  %v2220_v17 = vpop.f32.mrb[6].mxu0 }
 0x22b   :  { %v2221_v18 = vpop.f32.mrb[7].mxu0 }
 0x22c   :  { %v2222_v19 = vadd.f32 %v2221_v18, %v2220_v17  ;;  %v2984_v17 = vpop.permute.xlu0 %1748 }
 0x231   :  { %v2323_v22 = vpop.f32.mrb[0].mxu1 }
 0x232   :  { %v2324_v23 = vpop.f32.mrb[1].mxu1 }
 0x233   :  { %v2325_v24 = vadd.f32 %v2324_v23, %v2323_v22  ;;  %v2326_v25 = vpop.f32.mrb[2].mxu1 }
 0x234   :  { %v2327_v26 = vpop.f32.mrb[3].mxu1 }
 0x235   :  { %v1532_v28 = vadd.f32 %v2325_v24, %v2213_v7  ;;  %v2328_v29 = vadd.f32 %v2327_v26, %v2326_v25 }
 0x237   :  { %v1533_v31 = vadd.f32 %v2328_v29, %v2216_v11  ;;  %v1766_v32 = vmul.f32 %v1638_v0, %v1532_v28 }
 0x239   :  { %v1767_v33 = vmul.f32 %v1642_v13, %v1533_v31  ;;  %v2329_v34 = vpop.f32.mrb[4].mxu1 }
 0x23a   :  { %v2330_v35 = vpop.f32.mrb[5].mxu1 }
 0x23b   :  { %v1798_v37 = vadd.f32 %v1767_v33, %v1766_v32  ;;  %v2331_v38 = vadd.f32 %v2330_v35, %v2329_v34  ;;  %v2332_v39 = vpop.f32.mrb[6].mxu1  ;;  %v1682_v34 = vpop.permute.xlu0 %1681 }
 0x23c   :  { %v2333_v41 = vpop.f32.mrb[7].mxu1  ;;  %v2223_v42 = vpop.f32.mrb[8].mxu0 }
 0x23d   :  { %v2334_v43 = vadd.f32 %v2333_v41, %v2332_v39  ;;  %v1534_v44 = vadd.f32 %v2331_v38, %v2219_v16  ;;  %v2224_v45 = vpop.f32.mrb[9].mxu0 }
 0x23e   :  { %v2225_v46 = vadd.f32 %v2224_v45, %v2223_v42  ;;  %v2226_v47 = vpop.f32.mrb[10].mxu0 }
 0x23f   :  { %v1768_v48 = vmul.f32 %v1646_v20, %v1534_v44  ;;  %v1535_v49 = vadd.f32 %v2334_v43, %v2222_v19  ;;  %v2227_v50 = vpop.f32.mrb[11].mxu0  ;;  %v1662_v19 = vpop.permute.xlu1 %1661 }
 0x240   :  { %v2228_v51 = vadd.f32 %v2227_v50, %v2226_v47  ;;  %v2986_v50 = vpop.permute.xlu0 %1752 }
 0x241   :  { %v1799_v52 = vadd.f32 %v1798_v37, %v1768_v48  ;;  %v1769_v54 = vmul.f32 %v1650_v27, %v1535_v49  ;;  %v2335_v56 = vpop.f32.mrb[8].mxu1 }
 0x242   :  { %v2336_v58 = vpop.f32.mrb[9].mxu1 }
 0x243   :  { %v1800_v61 = vadd.f32 %v1799_v52, %v1769_v54  ;;  %v2337_v62 = vadd.f32 %v2336_v58, %v2335_v56  ;;  %v2338_v0 = vpop.f32.mrb[10].mxu1  ;;  %v1666_v37 = vpop.permute.xlu1 %1665 }
 0x244   :  { %v2339_v5 = vpop.f32.mrb[11].mxu1  ;;  %v2229_v6 = vpop.f32.mrb[12].mxu0 }
 0x245   :  { %v1536_v7 = vadd.f32 %v2337_v62, %v2225_v46  ;;  %v2340_v8 = vadd.f32 %v2339_v5, %v2338_v0  ;;  %v2230_v9 = vpop.f32.mrb[13].mxu0 }
 0x246   :  { %v2231_v11 = vadd.f32 %v2230_v9, %v2229_v6  ;;  %v2232_v12 = vpop.f32.mrb[14].mxu0 }
 0x247   :  { %v1770_v13 = vmul.f32 %v1654_v36, %v1536_v7  ;;  %v1537_v14 = vadd.f32 %v2340_v8, %v2228_v51  ;;  %v2233_v16 = vpop.f32.mrb[15].mxu0 }
 0x248   :  { %v2234_v18 = vadd.f32 %v2233_v16, %v2232_v12 }
 0x249   :  { %v1801_v20 = vadd.f32 %v1800_v61, %v1770_v13  ;;  %v1771_v22 = vmul.f32 %v1658_v60, %v1537_v14  ;;  %v2341_v23 = vpop.f32.mrb[12].mxu1 }
 0x24a   :  { %v2342_v24 = vpop.f32.mrb[13].mxu1 }
 0x24b   :  { %v1802_v25 = vadd.f32 %v1801_v20, %v1771_v22  ;;  %v2343_v26 = vadd.f32 %v2342_v24, %v2341_v23  ;;  %v2344_v27 = vpop.f32.mrb[14].mxu1 }
 0x24c   :  { %v2345_v28 = vpop.f32.mrb[15].mxu1  ;;  %v2235_v29 = vpop.f32.mrb[16].mxu0 }
 0x24d   :  { %v1538_v31 = vadd.f32 %v2343_v26, %v2231_v11  ;;  %v2346_v32 = vadd.f32 %v2345_v28, %v2344_v27  ;;  %v2236_v33 = vpop.f32.mrb[17].mxu0  ;;  %v1686_v11 = vpop.permute.xlu0 %1685 }
 0x24e   :  { %v2237_v35 = vadd.f32 %v2236_v33, %v2235_v29  ;;  %v2238_v36 = vpop.f32.mrb[18].mxu0 }
 0x24f   :  { %v1772_v38 = vmul.f32 %v1662_v19, %v1538_v31  ;;  %v1539_v39 = vadd.f32 %v2346_v32, %v2234_v18  ;;  %v2239_v41 = vpop.f32.mrb[19].mxu0 }
 0x250   :  { %v2240_v42 = vadd.f32 %v2239_v41, %v2238_v36 }
 0x251   :  { %v1803_v43 = vadd.f32 %v1802_v25, %v1772_v38  ;;  %v1773_v44 = vmul.f32 %v1666_v37, %v1539_v39  ;;  %v2347_v45 = vpop.f32.mrb[16].mxu1  ;;  %v1690_v28 = vpop.permute.xlu0 %1689 }
 0x252   :  { %v2348_v46 = vpop.f32.mrb[17].mxu1 }
 0x253   :  { %v1804_v47 = vadd.f32 %v1803_v43, %v1773_v44  ;;  %v2349_v48 = vadd.f32 %v2348_v46, %v2347_v45  ;;  %v2350_v49 = vpop.f32.mrb[18].mxu1 }
 0x254   :  { %v2351_v51 = vpop.f32.mrb[19].mxu1  ;;  %v2241_v52 = vpop.f32.mrb[20].mxu0 }
 0x255   :  { %v1540_v54 = vadd.f32 %v2349_v48, %v2237_v35  ;;  %v2352_v56 = vadd.f32 %v2351_v51, %v2350_v49  ;;  %v2242_v58 = vpop.f32.mrb[21].mxu0  ;;  %v2991_v35 = vpop.xlane.xlu1 %1842 }
 0x256   :  { %v2243_v60 = vadd.f32 %v2242_v58, %v2241_v52  ;;  %v2244_v61 = vpop.f32.mrb[22].mxu0  ;;  %v2993_v45 = vpop.permute.xlu0 %1760 }
 0x257   :  { %v1774_v62 = vmul.f32 %v2974_v15, %v1540_v54  ;;  %v1541_v0 = vadd.f32 %v2352_v56, %v2240_v42  ;;  %v2245_v5 = vpop.f32.mrb[23].mxu0 }
 0x258   :  { %v2246_v6 = vadd.f32 %v2245_v5, %v2244_v61 }
 0x259   :  { %v1805_v7 = vadd.f32 %v1804_v47, %v1774_v62  ;;  %v1775_v8 = vmul.f32 %v2978_v30, %v1541_v0  ;;  %v2353_v9 = vpop.f32.mrb[20].mxu1  ;;  %v2995_v51 = vpop.permute.xlu1 %1756 }
 0x25a   :  { %v2354_v12 = vpop.f32.mrb[21].mxu1  ;;  %v1694_v0 = vpop.permute.xlu0 %1693 }
 0x25b   :  { %v1806_v13 = vadd.f32 %v1805_v7, %v1775_v8  ;;  %v2355_v14 = vadd.f32 %v2354_v12, %v2353_v9  ;;  %v2356_v16 = vpop.f32.mrb[22].mxu1 }
 0x25c   :  { %v2357_v18 = vpop.f32.mrb[23].mxu1  ;;  %v2247_v19 = vpop.f32.mrb[24].mxu0 }
 0x25d   :  { %v1542_v20 = vadd.f32 %v2355_v14, %v2243_v60  ;;  %v2358_v22 = vadd.f32 %v2357_v18, %v2356_v16  ;;  %v2248_v23 = vpop.f32.mrb[25].mxu0 }
 0x25e   :  { %v2249_v24 = vadd.f32 %v2248_v23, %v2247_v19  ;;  %v2250_v25 = vpop.f32.mrb[26].mxu0 }
 0x25f   :  { %v1776_v15 = vmul.f32 %v2982_v57, %v1542_v20  ;;  %v1543_v26 = vadd.f32 %v2358_v22, %v2246_v6  ;;  %v2251_v27 = vpop.f32.mrb[27].mxu0 }
 0x260   :  { %v2252_v29 = vadd.f32 %v2251_v27, %v2250_v25 }
 0x261   :  { %v1777_v30 = vmul.f32 %v1682_v34, %v1543_v26  ;;  %v2359_v31 = vpop.f32.mrb[24].mxu1  ;;  %v1807_v32 = vadd.f32 %v1806_v13, %v1776_v15  ;;  %v1698_v13 = vpop.permute.xlu1 %1697 }
 0x262   :  { %v2360_v33 = vpop.f32.mrb[25].mxu1 }
 0x263   :  { %v2361_v36 = vadd.f32 %v2360_v33, %v2359_v31  ;;  %v1808_v37 = vadd.f32 %v1807_v32, %v1777_v30  ;;  %v2362_v38 = vpop.f32.mrb[26].mxu1 }
 0x264   :  { %v2363_v39 = vpop.f32.mrb[27].mxu1  ;;  %v2253_v41 = vpop.f32.mrb[28].mxu0 }
 0x265   :  { %v1544_v42 = vadd.f32 %v2361_v36, %v2249_v24  ;;  %v2364_v43 = vadd.f32 %v2363_v39, %v2362_v38  ;;  %v2254_v44 = vpop.f32.mrb[29].mxu0 }
 0x266   :  { %v2255_v57 = vadd.f32 %v2254_v44, %v2253_v41  ;;  %v2256_v46 = vpop.f32.mrb[30].mxu0 }
 0x267   :  { %v1778_v47 = vmul.f32 %v1686_v11, %v1544_v42  ;;  %v1545_v48 = vadd.f32 %v2364_v43, %v2252_v29  ;;  %v2257_v34 = vpop.f32.mrb[31].mxu0 }
 0x268   :  { %v2258_v49 = vadd.f32 %v2257_v34, %v2256_v46 }
 0x269   :  { %v1809_v52 = vadd.f32 %v1808_v37, %v1778_v47  ;;  %v1779_v54 = vmul.f32 %v1690_v28, %v1545_v48  ;;  %v2365_v56 = vpop.f32.mrb[28].mxu1 }
 0x26a   :  { %v2366_v58 = vpop.f32.mrb[29].mxu1 }
 0x26b   :  { %v1810_v60 = vadd.f32 %v1809_v52, %v1779_v54  ;;  %v2367_v61 = vadd.f32 %v2366_v58, %v2365_v56  ;;  %v2368_v62 = vpop.f32.mrb[30].mxu1 }
 0x26c   :  { %v2369_v5 = vpop.f32.mrb[31].mxu1  ;;  %v2259_v6 = vpop.f32.mrb[32].mxu0 }
 0x26d   :  { %v2370_v7 = vadd.f32 %v2369_v5, %v2368_v62  ;;  %v2260_v8 = vpop.f32.mrb[33].mxu0  ;;  %v1546_v9 = vadd.f32 %v2367_v61, %v2255_v57 }
 0x26e   :  { %v2261_v12 = vadd.f32 %v2260_v8, %v2259_v6  ;;  %v2262_v11 = vpop.f32.mrb[34].mxu0 }
 0x26f   :  { %v1780_v14 = vmul.f32 %v1694_v0, %v1546_v9  ;;  %v1547_v16 = vadd.f32 %v2370_v7, %v2258_v49  ;;  %v2263_v18 = vpop.f32.mrb[35].mxu0 }
 0x270   :  { %v2264_v19 = vadd.f32 %v2263_v18, %v2262_v11 }
 0x271   :  { %v1811_v20 = vadd.f32 %v1810_v60, %v1780_v14  ;;  %v1781_v22 = vmul.f32 %v1698_v13, %v1547_v16  ;;  %v2371_v23 = vpop.f32.mrb[32].mxu1 }
 0x272   :  { %v2372_v24 = vpop.f32.mrb[33].mxu1 }
 0x273   :  { %v2997_v25 = vadd.f32 %v1811_v20, %v1781_v22  ;;  %v2373_v15 = vadd.f32 %v2372_v24, %v2371_v23  ;;  %v2374_v26 = vpop.f32.mrb[34].mxu1 }
 0x274   :  { %v2375_v27 = vpop.f32.mrb[35].mxu1  ;;  %v2265_v28 = vpop.f32.mrb[36].mxu0 }
 0x275   :  { %v1548_v29 = vadd.f32 %v2373_v15, %v2261_v12  ;;  %v2376_v30 = vadd.f32 %v2375_v27, %v2374_v26  ;;  %v2266_v31 = vpop.f32.mrb[37].mxu0 }
 0x276   :  { %v2267_v32 = vadd.f32 %v2266_v31, %v2265_v28  ;;  %v2268_v33 = vpop.f32.mrb[38].mxu0 }
 0x277   :  { %v1549_v36 = vadd.f32 %v2376_v30, %v2264_v19  ;;  %v2269_v37 = vpop.f32.mrb[39].mxu0  ;;  %v1782_v39 = vmul.f32 %v2956_v63, %v1548_v29 }
 0x278   :  { %v2270_v38 = vadd.f32 %v2269_v37, %v2268_v33 }
 0x279   :  { %v1783_v41 = vmul.f32 %v2970_v59, %v1549_v36  ;;  %v2377_v42 = vpop.f32.mrb[36].mxu1 }
 0x27a   :  { %v2378_v43 = vpop.f32.mrb[37].mxu1 }
 0x27b   :  { %v1819_v44 = vadd.f32 %v1783_v41, %v1782_v39  ;;  %v2379_v57 = vadd.f32 %v2378_v43, %v2377_v42  ;;  %v2380_v46 = vpop.f32.mrb[38].mxu1 }
 0x27c   :  { %v2381_v47 = vpop.f32.mrb[39].mxu1  ;;  %v2271_v48 = vpop.f32.mrb[40].mxu0 }
 0x27d   :  { %v1550_v34 = vadd.f32 %v2379_v57, %v2267_v32  ;;  %v2382_v49 = vadd.f32 %v2381_v47, %v2380_v46  ;;  %v2272_v52 = vpop.f32.mrb[41].mxu0 }
 0x27e   :  { %v2273_v54 = vadd.f32 %v2272_v52, %v2271_v48  ;;  %v2274_v56 = vpop.f32.mrb[42].mxu0 }
 0x27f   :  { %v1784_v58 = vmul.f32 %v2958_v1, %v1550_v34  ;;  %v1551_v60 = vadd.f32 %v2382_v49, %v2270_v38  ;;  %v2275_v61 = vpop.f32.mrb[43].mxu0 }
 0x280   :  { %v2276_v62 = vadd.f32 %v2275_v61, %v2274_v56 }
 0x281   :  { %v1820_v63 = vadd.f32 %v1819_v44, %v1784_v58  ;;  %v1785_v59 = vmul.f32 %v2960_v2, %v1551_v60  ;;  %v2383_v0 = vpop.f32.mrb[40].mxu1 }
 0x282   :  { %v2384_v5 = vpop.f32.mrb[41].mxu1 }
 0x283   :  { %v1821_v6 = vadd.f32 %v1820_v63, %v1785_v59  ;;  %v2385_v7 = vadd.f32 %v2384_v5, %v2383_v0  ;;  %v2386_v8 = vpop.f32.mrb[42].mxu1 }
 0x284   :  { %v2387_v9 = vpop.f32.mrb[43].mxu1  ;;  %v2277_v12 = vpop.f32.mrb[44].mxu0 }
 0x285   :  { %v1552_v11 = vadd.f32 %v2385_v7, %v2273_v54  ;;  %v2388_v13 = vadd.f32 %v2387_v9, %v2386_v8  ;;  %v2278_v14 = vpop.f32.mrb[45].mxu0 }
 0x286   :  { %v2279_v16 = vadd.f32 %v2278_v14, %v2277_v12  ;;  %v2280_v18 = vpop.f32.mrb[46].mxu0 }
 0x287   :  { %v1786_v1 = vmul.f32 %v2962_v3, %v1552_v11  ;;  %v1553_v19 = vadd.f32 %v2388_v13, %v2276_v62  ;;  %v2281_v20 = vpop.f32.mrb[47].mxu0 }
 0x288   :  { %v2282_v22 = vadd.f32 %v2281_v20, %v2280_v18 }
 0x289   :  { %v1822_v23 = vadd.f32 %v1821_v6, %v1786_v1  ;;  %v1787_v2 = vmul.f32 %v2964_v4, %v1553_v19  ;;  %v2389_v24 = vpop.f32.mrb[44].mxu1 }
 0x28a   :  { %v2390_v15 = vpop.f32.mrb[45].mxu1 }
 0x28b   :  { %v1823_v26 = vadd.f32 %v1822_v23, %v1787_v2  ;;  %v2391_v27 = vadd.f32 %v2390_v15, %v2389_v24  ;;  %v2392_v28 = vpop.f32.mrb[46].mxu1 }
 0x28c   :  { %v2393_v29 = vpop.f32.mrb[47].mxu1  ;;  %v2283_v30 = vpop.f32.mrb[48].mxu0 }
 0x28d   :  { %v1554_v31 = vadd.f32 %v2391_v27, %v2279_v16  ;;  %v2394_v32 = vadd.f32 %v2393_v29, %v2392_v28  ;;  %v2284_v33 = vpop.f32.mrb[49].mxu0  ;;  %v1813_v28 = vrot.slane %v2997_v25, 4 }
 0x28e   :  { %v2285_v36 = vadd.f32 %v2284_v33, %v2283_v30  ;;  %v2286_v37 = vpop.f32.mrb[50].mxu0 }
 0x28f   :  { %v1788_v3 = vmul.f32 %v2966_v55, %v1554_v31  ;;  %v1555_v38 = vadd.f32 %v2394_v32, %v2282_v22  ;;  %v2287_v39 = vpop.f32.mrb[51].mxu0 }
 0x290   :  { %v2288_v41 = vadd.f32 %v2287_v39, %v2286_v37 }
 0x291   :  { %v1824_v42 = vadd.f32 %v1823_v26, %v1788_v3  ;;  %v1789_v4 = vmul.f32 %v2968_v53, %v1555_v38  ;;  %v2395_v43 = vpop.f32.mrb[48].mxu1 }
 0x292   :  { %v2396_v44 = vpop.f32.mrb[49].mxu1 }
 0x293   :  { %v1825_v57 = vadd.f32 %v1824_v42, %v1789_v4  ;;  %v2397_v46 = vadd.f32 %v2396_v44, %v2395_v43  ;;  %v2398_v47 = vpop.f32.mrb[50].mxu1 }
 0x294   :  { %v2399_v48 = vpop.f32.mrb[51].mxu1  ;;  %v2289_v34 = vpop.f32.mrb[52].mxu0 }
 0x295   :  { %v1556_v49 = vadd.f32 %v2397_v46, %v2285_v36  ;;  %v2400_v52 = vadd.f32 %v2399_v48, %v2398_v47  ;;  %v2290_v54 = vpop.f32.mrb[53].mxu0 }
 0x296   :  { %v2291_v56 = vadd.f32 %v2290_v54, %v2289_v34  ;;  %v2292_v58 = vpop.f32.mrb[54].mxu0 }
 0x297   :  { %v1790_v55 = vmul.f32 %v2972_v10, %v1556_v49  ;;  %v1557_v60 = vadd.f32 %v2400_v52, %v2288_v41  ;;  %v2293_v61 = vpop.f32.mrb[55].mxu0 }
 0x298   :  { %v2294_v62 = vadd.f32 %v2293_v61, %v2292_v58 }
 0x299   :  { %v1826_v63 = vadd.f32 %v1825_v57, %v1790_v55  ;;  %v1791_v53 = vmul.f32 %v2976_v21, %v1557_v60  ;;  %v2401_v59 = vpop.f32.mrb[52].mxu1  ;;  %v1844_v57 = vmax.f32 %v2991_v35, 1.0 }
 0x29a   :  { %v2402_v0 = vpop.f32.mrb[53].mxu1 }
 0x29b   :  { %v1827_v5 = vadd.f32 %v1826_v63, %v1791_v53  ;;  %v2403_v6 = vadd.f32 %v2402_v0, %v2401_v59  ;;  %v2404_v7 = vpop.f32.mrb[54].mxu1  ;;  %2463 = vrcp.f32 %v1844_v57 }
 0x29c   :  { %v2405_v8 = vpop.f32.mrb[55].mxu1  ;;  %v2295_v9 = vpop.f32.mrb[56].mxu0 }
 0x29d   :  { %v1558_v12 = vadd.f32 %v2403_v6, %v2291_v56  ;;  %v2406_v11 = vadd.f32 %v2405_v8, %v2404_v7  ;;  %v2296_v13 = vpop.f32.mrb[57].mxu0  ;;  %v1862_v7 = vld [vmem:[%s3039_s3] sm:$0x3] }
 0x29e   :  { %v2297_v14 = vadd.f32 %v2296_v13, %v2295_v9  ;;  %v2298_v16 = vpop.f32.mrb[58].mxu0 }
 0x29f   :  { %v1792_v10 = vmul.f32 %v2980_v40, %v1558_v12  ;;  %v1559_v18 = vadd.f32 %v2406_v11, %v2294_v62  ;;  %v2299_v1 = vpop.f32.mrb[59].mxu0  ;;  %v1864_v12 = vrot.slane %v1862_v7, 1 }
 0x2a0   :  { %v2300_v19 = vadd.f32 %v2299_v1, %v2298_v16 }
 0x2a1   :  { %v1828_v20 = vadd.f32 %v1827_v5, %v1792_v10  ;;  %v1793_v21 = vmul.f32 %v2984_v17, %v1559_v18  ;;  %v2407_v22 = vpop.f32.mrb[56].mxu1  ;;  %v1814_v17 = vadd.f32 %v1813_v28, %v2997_v25 }
 0x2a2   :  { %v2408_v23 = vpop.f32.mrb[57].mxu1 }
 0x2a3   :  { %v1829_v2 = vadd.f32 %v1828_v20, %v1793_v21  ;;  %v2409_v24 = vadd.f32 %v2408_v23, %v2407_v22  ;;  %v2410_v15 = vpop.f32.mrb[58].mxu1  ;;  %v1815_v47 = vrot.slane %v1814_v17, 2 }
 0x2a4   :  { %v2411_v26 = vpop.f32.mrb[59].mxu1  ;;  %v2301_v27 = vpop.f32.mrb[60].mxu0 }
 0x2a5   :  { %v1560_v29 = vadd.f32 %v2409_v24, %v2297_v14  ;;  %v2412_v30 = vadd.f32 %v2411_v26, %v2410_v15  ;;  %v2302_v31 = vpop.f32.mrb[61].mxu0  ;;  %v1816_v25 = vadd.f32 %v1815_v47, %v1814_v17  ;;  %v2464_v63 = vpop.eup %2463 }
 0x2a6   :  { %v2303_v32 = vadd.f32 %v2302_v31, %v2301_v27  ;;  %v2304_v40 = vpop.f32.mrb[62].mxu0 }
 0x2a7   :  { %v1794_v33 = vmul.f32 %v2986_v50, %v1560_v29  ;;  %v1561_v36 = vadd.f32 %v2412_v30, %v2300_v19  ;;  %v2305_v37 = vpop.f32.mrb[63].mxu0  ;;  %v1765_v50 = vpop.permute.xlu0 %1764  ;;  %v1817_v55 = vrot.slane %v1816_v25, 1 }
 0x2a8   :  { %v2306_v3 = vadd.f32 %v2305_v37, %v2304_v40 }
 0x2a9   :  { %v1830_v38 = vadd.f32 %v1829_v2, %v1794_v33  ;;  %v1795_v39 = vmul.f32 %v2995_v51, %v1561_v36  ;;  %v2413_v41 = vpop.f32.mrb[60].mxu1  ;;  %v1846_v51 = vrot.slane %v1844_v57, 1  ;;  %v1818_v62 = vadd.f32 %v1817_v55, %v1816_v25 }
 0x2aa   :  { %v2414_v42 = vpop.f32.mrb[61].mxu1 }
 0x2ab   :  { %v2415_v4 = vadd.f32 %v2414_v42, %v2413_v41  ;;  %v2416_v43 = vpop.f32.mrb[62].mxu1  ;;  %v1831_v44 = vadd.f32 %v1830_v38, %v1795_v39  ;;  %2465 = vrcp.f32 %v1846_v51  ;;  %v1850_v59 = vmul.f32 %v2464_v63, %v1818_v62 }
 0x2ac   :  { %v2417_v46 = vpop.f32.mrb[63].mxu1 }
 0x2ad   :  { %v1562_v48 = vadd.f32 %v2415_v4, %v2303_v32  ;;  %v2418_v34 = vadd.f32 %v2417_v46, %v2416_v43 }
 0x2af   :  { %v1796_v49 = vmul.f32 %v2993_v45, %v1562_v48  ;;  %v1563_v52 = vadd.f32 %v2418_v34, %v2306_v3  ;;  %v2194_v45 = vld [vmem:[%s3040_s4] ss:$0 sm:$0xff] }
 0x2b0   :  { %v1860_v9 = vadd.f32 %v2194_v45, %v1850_v59 }
 0x2b1   :  { %v1832_v54 = vadd.f32 %v1831_v44, %v1796_v49  ;;  %v1797_v56 = vmul.f32 %v1765_v50, %v1563_v52 }
 0x2b2   :  { %v1867_v13 = vsub.f32 %v1860_v9, %v1862_v7 }
 0x2b3   :  { %v1833_v58 = vadd.f32 %v1832_v54, %v1797_v56 }
 0x2b4   :  { %v1869_v10 = vmul.f32 %v1867_v13, %v1867_v13 }
 0x2b5   :  { %v1834_v60 = vrot.slane %v1833_v58, 4  ;;  %v2466_v6 = vpop.eup %2465 }
 0x2b7   :  { %v1835_v61 = vadd.f32 %v1834_v60, %v1833_v58 }
 0x2b9   :  { %v1836_v35 = vrot.slane %v1835_v61, 2 }
 0x2bb   :  { %v1837_v53 = vadd.f32 %v1836_v35, %v1835_v61 }
 0x2bd   :  { %v1838_v0 = vrot.slane %v1837_v53, 1 }
 0x2bf   :  { %v1839_v5 = vadd.f32 %v1838_v0, %v1837_v53 }
 0x2c1   :  { %v1852_v8 = vmul.f32 %v2466_v6, %v1839_v5 }
 0x2c3   :  { %v1861_v11 = vadd.f32 %v2194_v45, %v1852_v8 }
 0x2c5   :  { %v1868_v14 = vsub.f32 %v1861_v11, %v1864_v12 }
 0x2c7   :  { %v1870_v16 = vmul.f32 %v1868_v14, %v1868_v14 }
 0x2c9   :  { %v1873_v18 = vrot.slane %v1870_v16, 7 }
 0x2cb   :  { %v1875_v1 = vsel %vm1874_vm13, %v1873_v18, %v1869_v10 }
 0x2cc   :  { %v1877_v19 = vsel %vm57_vm0, %v1875_v1, 0.0 }
 0x2cd   :  { %1878 = vadd.xlane.f32.xlu0 %v1877_v19 }
 0x35a   :  { %v1879_v20 = vpop.xlane.xlu0 %1878 }
 0x35b   :  { %v1880_v21 = vrot.slane %v1879_v20, 4 }
 0x35d   :  { %v1881_v22 = vadd.f32 %v1880_v21, %v1879_v20 }
 0x35f   :  { %v1882_v23 = vrot.slane %v1881_v22, 2 }
 0x361   :  { %v1883_v2 = vadd.f32 %v1882_v23, %v1881_v22 }
 0x363   :  { %v1884_v24 = vrot.slane %v1883_v2, 1 }
 0x365   :  { %v1885_v15 = vadd.f32 %v1884_v24, %v1883_v2 }
 0x367   :  { %2421 = vpush %v1885_v15 }
 0x398   :  { %s2422_s3 = spop %2421 }
 0x399   :  { %s1887_s4 = smul.f32 0.125, %s2422_s3 }
 0x39b   :  { %1889 = sst [smem:[#allocation9]] %s1887_s4 }
 0x39c   :  { %2520 = shalt.err (!%p2517_p4)
}
 0x39d   :  { %s2532_s10 = smov [#allocation9]  }
 0x39e   :  { %1897 = dma.smem_to_hbm %s2532_s10, 16, %s3042_s6, [#allocation6]  }
 0x39f   :  { %2525 = dma.done.wait [#allocation6], 16  }
 0x3a0   :  { %2526 = vsyncadd [#allocation6], 4294967280 }
 0x3a1   :  { %1901 = sfence }
 0x3a2   :  { %1902 = vsyncpa [#allocation5], 1 }
 0x3a3   :  { %1903 = vsyncpa [#allocation8], 1 }
 0x3a4   :  { %1904 = vsyncpa [#allocation6], 1 }

</bundles_post_ra>
